<compile_context>
chip_gen: v7x
topology: tpu7x:2x2x1
jax: 0.10.0
libtpu: 0.0.40
codegen_flags: <defaults>
</compile_context>

<pallas_src>
import functools

import jax
import jax.numpy as jnp
from jax.experimental import pallas as pl
from jax.experimental.pallas import tpu as pltpu


COMPUTE_DTYPE = jnp.bfloat16   # matmul operand / stored-activation dtype; accumulation f32


# ----------------------------------------------------------------------------
# Host-side separable -> Kronecker resampling matrices (tiny, built once, cached)
# ----------------------------------------------------------------------------
def bilinear_matrix(out_size, in_size):
    """Row-interpolation matrix matching F.interpolate(mode='bilinear', align_corners=False)."""
    if in_size == 1:
        return jnp.ones((out_size, 1), jnp.float32)
    scale = in_size / out_size
    dst = jnp.arange(out_size, dtype=jnp.float32)
    src = jnp.clip((dst + 0.5) * scale - 0.5, 0.0, in_size - 1)
    lo = jnp.floor(src).astype(jnp.int32)
    hi = jnp.minimum(lo + 1, in_size - 1)
    frac = src - lo.astype(jnp.float32)
    rows = jnp.arange(out_size)
    Wm = jnp.zeros((out_size, in_size), jnp.float32)
    Wm = Wm.at[rows, lo].add(1.0 - frac)
    Wm = Wm.at[rows, hi].add(frac)
    return Wm


def avgpool_matrix(in_size):
    """2x2 avg-pool row matrix (ceil_mode=False / floor behavior, like nn.AvgPool2d(2, 2))."""
    out = in_size // 2
    idx = jnp.arange(out)
    P = jnp.zeros((out, in_size), jnp.float32)
    P = P.at[idx, 2 * idx].set(0.5)
    P = P.at[idx, 2 * idx + 1].set(0.5)
    return P


@functools.lru_cache(maxsize=None)
def _avgpool_kron(h, w):
    """K (h*w, (h//2)*(w//2)) s.t. pooled_flat = x_flat @ K.  Cached, bf16."""
    Mh, Mw = avgpool_matrix(h), avgpool_matrix(w)
    return jnp.kron(Mh, Mw).T.astype(COMPUTE_DTYPE)


@functools.lru_cache(maxsize=None)
def _bilinear_kron(ih, iw, oh, ow):
    """K (ih*iw, oh*ow) s.t. upsampled_flat = x_flat @ K.  Cached, bf16."""
    Mh, Mw = bilinear_matrix(oh, ih), bilinear_matrix(ow, iw)
    return jnp.kron(Mh, Mw).T.astype(COMPUTE_DTYPE)


# ----------------------------------------------------------------------------
# Kernel 1: fused backbone — all stages of [avg-pool Kron matmul -> 1x1 conv -> ReLU]
# in one call, gridded over batch.  Intermediates never leave VMEM/vregs.
#   refs = [x, (K_s, W_s, b_s) * n_stages, feat_out_s * n_stages]
# ----------------------------------------------------------------------------
def _backbone_kernel(*refs, n_stages):
    x_ref = refs[0]
    out_refs = refs[1 + 3 * n_stages:]
    x = x_ref[0].astype(COMPUTE_DTYPE)                      # (Cin, P0)
    for s in range(n_stages):
        k_ref = refs[1 + 3 * s]                             # (P_prev, P_s)  bf16
        w_ref = refs[2 + 3 * s]                             # (C_s, C_prev)  bf16
        b_ref = refs[3 + 3 * s]                             # (C_s, 1)       f32
        pooled = jnp.dot(x, k_ref[...],
                         preferred_element_type=jnp.float32).astype(COMPUTE_DTYPE)
        acc = jnp.dot(w_ref[...], pooled, preferred_element_type=jnp.float32)
        acc = jnp.maximum(acc + b_ref[...], 0.0)            # bias + ReLU in f32
        x = acc.astype(COMPUTE_DTYPE)
        out_refs[s][0] = x                                   # (C_s, P_s) bf16 feature


# ----------------------------------------------------------------------------
# Kernel 2: fused decoder — lateral 1x1 conv + ReLU per stage, bilinear-Kron upsample,
# f32 fusion sum, classification head.  One call, gridded over batch.
#   refs = [feat_i * n, Wl_i * n, bl_i * n, Kup_j * n_up, Wh, bh, out]
# ----------------------------------------------------------------------------
def _decoder_kernel(*refs, n_feat, needs_up):
    n_up = int(sum(needs_up))
    feats = refs[0:n_feat]
    wls = refs[n_feat:2 * n_feat]
    bls = refs[2 * n_feat:3 * n_feat]
    kups = refs[3 * n_feat:3 * n_feat + n_up]
    wh = refs[3 * n_feat + n_up]
    bh = refs[3 * n_feat + n_up + 1]
    o_ref = refs[3 * n_feat + n_up + 2]

    fused = None
    ku = 0
    for i in range(n_feat):
        lat = jnp.dot(wls[i][...], feats[i][0],
                      preferred_element_type=jnp.float32)          # (mid, P_i)
        lat = jnp.maximum(lat + bls[i][...], 0.0)                   # bias + ReLU, f32
        if needs_up[i]:
            up = jnp.dot(lat.astype(COMPUTE_DTYPE), kups[ku][...],
                         preferred_element_type=jnp.float32)        # (mid, P0)
            ku += 1
        else:
            up = lat
        fused = up if fused is None else fused + up                 # f32 accumulation
    head = jnp.dot(wh[...], fused.astype(COMPUTE_DTYPE),
                   preferred_element_type=jnp.float32) + bh[...]    # (nc, P0)
    o_ref[0] = head.astype(o_ref.dtype)                             # f32 pred at interface


# ----------------------------------------------------------------------------
# Kernel 3: bilinear upsample via a single Kron matmul (for pred_reshape).
# ----------------------------------------------------------------------------
def _resample_kron_kernel(x_ref, k_ref, o_ref):
    x = x_ref[0].astype(k_ref.dtype)                                # bf16 MXU operands
    o_ref[0] = jnp.dot(x, k_ref[...],
                       preferred_element_type=jnp.float32).astype(o_ref.dtype)


def interpolate_bilinear_nchw(x_nchw, size):
    B, C, H, W = x_nchw.shape
    oh, ow = size
    P_in, P_out = H * W, oh * ow
    K = _bilinear_kron(H, W, oh, ow)
    x2 = x_nchw.reshape(B, C, P_in)
    out = pl.pallas_call(
        _resample_kron_kernel,
        out_shape=jax.ShapeDtypeStruct((B, C, P_out), jnp.float32),
        grid=(B,),
        in_specs=[pl.BlockSpec((1, C, P_in), lambda b: (b, 0, 0)),
                  pl.BlockSpec((P_in, P_out), lambda b: (0, 0))],
        out_specs=pl.BlockSpec((1, C, P_out), lambda b: (b, 0, 0)),
        compiler_params=pltpu.CompilerParams(dimension_semantics=("parallel",)),
    )(x2, K)
    return out.reshape(B, C, oh, ow)


# ----------------------------------------------------------------------------
# Kernel 4: mean softmax cross-entropy.  Per-batch partial sums accumulated directly
# into the output block (constant block index over pixel tiles); batch axis parallel.
# ----------------------------------------------------------------------------
def _ce_kernel(logits_ref, tgt_ref, out_ref):
    @pl.when(pl.program_id(1) == 0)
    def _():
        out_ref[...] = jnp.zeros_like(out_ref)

    logits = logits_ref[0].astype(jnp.float32)                      # (C, tp)
    tgt = tgt_ref[0]                                                # (1, tp) int32
    m = jnp.max(logits, axis=0, keepdims=True)
    lse = jnp.log(jnp.sum(jnp.exp(logits - m), axis=0, keepdims=True)) + m
    iota = jax.lax.broadcasted_iota(jnp.int32, logits.shape, 0)
    picked = jnp.sum(jnp.where(iota == tgt, logits, 0.0), axis=0, keepdims=True)
    partial = jnp.sum(lse - picked, axis=1, keepdims=True)          # (1, 1)
    out_ref[...] += partial.reshape(1, 1, 1)


def _pick_pixel_tile(P, cap=8192):
    if P <= cap:
        return P
    t = cap - (cap % 128)
    while t >= 128:
        if P % t == 0:
            return t
        t -= 128
    return P  # TODO(synk): awkward large prime-ish P falls back to a single oversized block


def cross_entropy_mean_nchw(pred, target):
    """pred: (B, C, H, W) float, target: (B, H, W) int -> scalar mean CE.
    TODO(synk): no ignore_index / class-weight handling (matches default CrossEntropyLoss)."""
    B, C, H, W = pred.shape
    P = H * W
    tp = _pick_pixel_tile(P)
    n_tiles = P // tp
    logits = pred.reshape(B, C, P)
    tgt = target.astype(jnp.int32).reshape(B, 1, P)
    sums = pl.pallas_call(
        _ce_kernel,
        out_shape=jax.ShapeDtypeStruct((B, 1, 1), jnp.float32),
        grid=(B, n_tiles),
        in_specs=[pl.BlockSpec((1, C, tp), lambda b, p: (b, 0, p)),
                  pl.BlockSpec((1, 1, tp), lambda b, p: (b, 0, p))],
        out_specs=pl.BlockSpec((1, 1, 1), lambda b, p: (b, 0, 0)),
        compiler_params=pltpu.CompilerParams(
            dimension_semantics=("parallel", "arbitrary")),
    )(logits, tgt)
    return jnp.sum(sums) / float(B * P)


# ----------------------------------------------------------------------------
# Synthetic backbone / decoder / loss layer (deterministic parameter init)
# ----------------------------------------------------------------------------
class SimpleBackbone:
    """4 stages of [2x2 avg-pool -> 1x1 conv + ReLU], fused into one pallas_call."""

    def __init__(self, key, in_ch=3, stage_chs=(16, 32, 48, 64)):
        self.in_ch = in_ch
        self.stage_chs = tuple(stage_chs)
        self.weights, self.biases = [], []
        c = in_ch
        for i, co in enumerate(stage_chs):
            kw = jax.random.fold_in(key, i)
            w = jax.random.normal(kw, (co, c), jnp.float32) * (float(c) ** -0.5)
            self.weights.append(w.astype(COMPUTE_DTYPE))        # pre-cast once
            self.biases.append(jnp.full((co, 1), 0.01, jnp.float32))
            c = co

    def __call__(self, img_nchw):
        B, Cin, H, W = img_nchw.shape
        n = len(self.stage_chs)

        # Per-stage pooled sizes and pool Kron matrices.
        hs, ws, kmats = [], [], []
        h, w = H, W
        for _ in range(n):
            kmats.append(_avgpool_kron(h, w))
            h, w = h // 2, w // 2
            hs.append(h)
            ws.append(w)

        x2 = img_nchw.reshape(B, Cin, H * W)                    # free reshape, f32 input
        args = [x2]
        in_specs = [pl.BlockSpec((1, Cin, H * W), lambda b: (b, 0, 0))]
        for s in range(n):
            args += [kmats[s], self.weights[s], self.biases[s]]
            in_specs += [
                pl.BlockSpec(kmats[s].shape, lambda b: (0, 0)),
                pl.BlockSpec(self.weights[s].shape, lambda b: (0, 0)),
                pl.BlockSpec(self.biases[s].shape, lambda b: (0, 0)),
            ]
        out_shapes = tuple(
            jax.ShapeDtypeStruct((B, self.stage_chs[s], hs[s] * ws[s]), COMPUTE_DTYPE)
            for s in range(n))
        out_specs = tuple(
            pl.BlockSpec((1, self.stage_chs[s], hs[s] * ws[s]), lambda b: (b, 0, 0))
            for s in range(n))

        # TODO(synk): for large images, tile the pixel axis and set vmem_limit_bytes
        # (v7x has 64 MiB VMEM); whole-slab blocks are fine at these small shapes.
        feats = pl.pallas_call(
            functools.partial(_backbone_kernel, n_stages=n),
            out_shape=out_shapes,
            grid=(B,),
            in_specs=in_specs,
            out_specs=out_specs,
            compiler_params=pltpu.CompilerParams(dimension_semantics=("parallel",)),
        )(*args)
        return [feats[s].reshape(B, self.stage_chs[s], hs[s], ws[s]) for s in range(n)]


class SimpleFuseDecoder:
    """Per-stage lateral 1x1 conv + ReLU -> bilinear upsample to stage-1 size -> sum
    -> 1x1 conv head.  Fused into one pallas_call."""

    def __init__(self, key, in_chs, mid=32, num_classes=5):
        self.in_chs = tuple(in_chs)
        self.mid = mid
        self.num_classes = num_classes
        self.lat_w, self.lat_b = [], []
        for i, ci in enumerate(in_chs):
            kw = jax.random.fold_in(key, 100 + i)
            w = jax.random.normal(kw, (mid, ci), jnp.float32) * (float(ci) ** -0.5)
            self.lat_w.append(w.astype(COMPUTE_DTYPE))          # pre-cast once
            self.lat_b.append(jnp.zeros((mid, 1), jnp.float32))
        kh = jax.random.fold_in(key, 999)
        self.head_w = (jax.random.normal(kh, (num_classes, mid), jnp.float32)
                       * (float(mid) ** -0.5)).astype(COMPUTE_DTYPE)
        self.head_b = jnp.zeros((num_classes, 1), jnp.float32)

    def __call__(self, *features):
        n = len(features)
        B = features[0].shape[0]
        oh, ow = features[0].shape[2], features[0].shape[3]
        P0 = oh * ow

        feats_flat, needs_up, kups = [], [], []
        for f in features:
            _, ci, h, w = f.shape
            feats_flat.append(f.reshape(B, ci, h * w))
            up = (h != oh) or (w != ow)
            needs_up.append(up)
            if up:
                kups.append(_bilinear_kron(h, w, oh, ow))

        args, in_specs = [], []
        for f in feats_flat:
            args.append(f)
            in_specs.append(pl.BlockSpec((1,) + f.shape[1:], lambda b: (b, 0, 0)))
        for w in self.lat_w:
            args.append(w)
            in_specs.append(pl.BlockSpec(w.shape, lambda b: (0, 0)))
        for bb in self.lat_b:
            args.append(bb)
            in_specs.append(pl.BlockSpec(bb.shape, lambda b: (0, 0)))
        for k in kups:
            args.append(k)
            in_specs.append(pl.BlockSpec(k.shape, lambda b: (0, 0)))
        args += [self.head_w, self.head_b]
        in_specs += [pl.BlockSpec(self.head_w.shape, lambda b: (0, 0)),
                     pl.BlockSpec(self.head_b.shape, lambda b: (0, 0))]

        out = pl.pallas_call(
            functools.partial(_decoder_kernel, n_feat=n, needs_up=tuple(needs_up)),
            out_shape=jax.ShapeDtypeStruct((B, self.num_classes, P0), jnp.float32),
            grid=(B,),
            in_specs=in_specs,
            out_specs=pl.BlockSpec((1, self.num_classes, P0), lambda b: (b, 0, 0)),
            compiler_params=pltpu.CompilerParams(dimension_semantics=("parallel",)),
        )(*args)
        return out.reshape(B, self.num_classes, oh, ow)


class CrossEntropyLossLayer:
    """Mirrors loss_layer(result_dict, target): pixel-wise CE (mean) in a Pallas kernel."""
    def __call__(self, result, target):
        pred = result["pred"] if isinstance(result, dict) else result   # (B, C, H, W)
        return cross_entropy_mean_nchw(pred, target)


# ----------------------------------------------------------------------------
# EncoderDecoder wrapper — forward semantics match the PyTorch module exactly
# ----------------------------------------------------------------------------
class EncoderDecoder:
    def __init__(self, backbone, decoder, loss_layer=None, neck=None,
                 decoder_input_tuple=False, decoder_input_include_h_w=False,
                 loss_layer_input_pred=False, pred_reshape=True,
                 extra_operations=(), stages=4):
        self.backbone = backbone
        self.decoder = decoder
        self.loss_layer = loss_layer
        self.stages = stages
        self.neck = neck
        self.extra_opts = list(extra_operations)
        self.d_h_w = decoder_input_include_h_w
        self.decoder_input_tuple = decoder_input_tuple
        self.pred_reshape = pred_reshape
        self.loss_layer_input_pred = loss_layer_input_pred
        # TODO(synk): extera_init / extra_operation (loss_statistic / pred_statistic)
        # depend on a global config registry (global_dict); no Pallas equivalent; skipped.

    def __call__(self, img, target=None):
        features = self.backbone(img)
        if self.neck is not None:
            features = self.neck(features)
        if self.d_h_w:
            h, w = img.shape[-2:]
            arghw = {"h": h, "w": w}
        else:
            arghw = {}
        if self.decoder_input_tuple:
            result = self.decoder(features, **arghw)
        else:
            result = self.decoder(*features, **arghw)
        if not isinstance(result, dict):
            result = {"pred": result}
        if self.pred_reshape:
            if result["pred"].shape[-2:] != img.shape[-2:]:
                result["pred"] = interpolate_bilinear_nchw(result["pred"], img.shape[-2:])
        skip_loss = target is None or self.loss_layer is None
        if not skip_loss:
            loss_in = result["pred"] if self.loss_layer_input_pred else result
            loss = self.loss_layer(loss_in, target)
            result["losses"] = loss if isinstance(loss, dict) else {"main_loss": loss}
        return result


# ----------------------------------------------------------------------------
if __name__ == "__main__":
    key = jax.random.PRNGKey(0)
    k_img, k_tgt, k_bb, k_dec = jax.random.split(key, 4)

    B, CIN, H, W = 2, 3, 32, 32
    NUM_CLASSES = 5
    STAGE_CHS = (16, 32, 48, 64)

    img = jax.random.normal(k_img, (B, CIN, H, W), jnp.float32)
    target = jax.random.randint(k_tgt, (B, H, W), 0, NUM_CLASSES)

    model = EncoderDecoder(
        backbone=SimpleBackbone(k_bb, in_ch=CIN, stage_chs=STAGE_CHS),
        decoder=SimpleFuseDecoder(k_dec, in_chs=STAGE_CHS, mid=32, num_classes=NUM_CLASSES),
        loss_layer=CrossEntropyLossLayer(),
        stages=4,
    )

    result = model(img, target)
    result = jax.block_until_ready(result)

    assert result["pred"].shape == (B, NUM_CLASSES, H, W)
    assert result["pred"].dtype == jnp.float32
    assert result["losses"]["main_loss"].shape == ()
    assert bool(jnp.isfinite(result["losses"]["main_loss"]))
    print("KERNEL_OK")
</pallas_src>

<mosaic_0001>
module attributes {stable_mosaic.version = 11 : i64} {
  func.func @_backbone_kernel(%arg0: i32, %arg1: memref<1x3x1024xf32, #tpu.memory_space<vmem>>, %arg2: memref<1024x256xbf16, #tpu.memory_space<vmem>>, %arg3: memref<16x3xbf16, #tpu.memory_space<vmem>>, %arg4: memref<16x1xf32, #tpu.memory_space<vmem>>, %arg5: memref<256x64xbf16, #tpu.memory_space<vmem>>, %arg6: memref<32x16xbf16, #tpu.memory_space<vmem>>, %arg7: memref<32x1xf32, #tpu.memory_space<vmem>>, %arg8: memref<64x16xbf16, #tpu.memory_space<vmem>>, %arg9: memref<48x32xbf16, #tpu.memory_space<vmem>>, %arg10: memref<48x1xf32, #tpu.memory_space<vmem>>, %arg11: memref<16x4xbf16, #tpu.memory_space<vmem>>, %arg12: memref<64x48xbf16, #tpu.memory_space<vmem>>, %arg13: memref<64x1xf32, #tpu.memory_space<vmem>>, %arg14: memref<1x16x256xbf16, #tpu.memory_space<vmem>>, %arg15: memref<1x32x64xbf16, #tpu.memory_space<vmem>>, %arg16: memref<1x48x16xbf16, #tpu.memory_space<vmem>>, %arg17: memref<1x64x4xbf16, #tpu.memory_space<vmem>>) attributes {dimension_semantics = [#tpu.dimension_semantics<parallel>], iteration_bounds = array<i64: 2>, scalar_prefetch = 0 : i64, scratch_operands = 0 : i64, tpu.core_type = #tpu.core_type<tc>, window_params = [{transform_indices = @transform_0, window_bounds = array<i64: 1, 3, 1024>}, {pipeline_mode = #tpu.pipeline_mode<synchronous>, transform_indices = @transform_1, window_bounds = array<i64: 1024, 256>}, {pipeline_mode = #tpu.pipeline_mode<synchronous>, transform_indices = @transform_2, window_bounds = array<i64: 16, 3>}, {pipeline_mode = #tpu.pipeline_mode<synchronous>, transform_indices = @transform_3, window_bounds = array<i64: 16, 1>}, {pipeline_mode = #tpu.pipeline_mode<synchronous>, transform_indices = @transform_4, window_bounds = array<i64: 256, 64>}, {pipeline_mode = #tpu.pipeline_mode<synchronous>, transform_indices = @transform_5, window_bounds = array<i64: 32, 16>}, {pipeline_mode = #tpu.pipeline_mode<synchronous>, transform_indices = @transform_6, window_bounds = array<i64: 32, 1>}, {pipeline_mode = #tpu.pipeline_mode<synchronous>, transform_indices = @transform_7, window_bounds = array<i64: 64, 16>}, {pipeline_mode = #tpu.pipeline_mode<synchronous>, transform_indices = @transform_8, window_bounds = array<i64: 48, 32>}, {pipeline_mode = #tpu.pipeline_mode<synchronous>, transform_indices = @transform_9, window_bounds = array<i64: 48, 1>}, {pipeline_mode = #tpu.pipeline_mode<synchronous>, transform_indices = @transform_10, window_bounds = array<i64: 16, 4>}, {pipeline_mode = #tpu.pipeline_mode<synchronous>, transform_indices = @transform_11, window_bounds = array<i64: 64, 48>}, {pipeline_mode = #tpu.pipeline_mode<synchronous>, transform_indices = @transform_12, window_bounds = array<i64: 64, 1>}, {transform_indices = @transform_13, window_bounds = array<i64: 1, 16, 256>}, {transform_indices = @transform_14, window_bounds = array<i64: 1, 32, 64>}, {transform_indices = @transform_15, window_bounds = array<i64: 1, 48, 16>}, {transform_indices = @transform_16, window_bounds = array<i64: 1, 64, 4>}]} {
    %c0 = arith.constant 0 : index
    %c0_0 = arith.constant 0 : index
    %c0_1 = arith.constant 0 : index
    %0 = vector.load %arg1[%c0, %c0_0, %c0_1] : memref<1x3x1024xf32, #tpu.memory_space<vmem>>, vector<1x3x1024xf32>
    %1 = vector.shape_cast %0 : vector<1x3x1024xf32> to vector<3x1024xf32>
    %2 = arith.truncf %1 : vector<3x1024xf32> to vector<3x1024xbf16>
    %c0_2 = arith.constant 0 : index
    %c0_3 = arith.constant 0 : index
    %3 = vector.load %arg2[%c0_2, %c0_3] : memref<1024x256xbf16, #tpu.memory_space<vmem>>, vector<1024x256xbf16>
    %cst = arith.constant dense<0.000000e+00> : vector<3x256xf32>
    %4 = tpu.matmul %2, %3, %cst {dimension_numbers = #tpu.dot_dimension_numbers<[1], [0], [0], [1], [0, 0, 1, 1], [], []>} : vector<3x1024xbf16>, vector<1024x256xbf16>, vector<3x256xf32> -> vector<3x256xf32>
    %5 = arith.truncf %4 : vector<3x256xf32> to vector<3x256xbf16>
    %c0_4 = arith.constant 0 : index
    %c0_5 = arith.constant 0 : index
    %6 = vector.load %arg3[%c0_4, %c0_5] : memref<16x3xbf16, #tpu.memory_space<vmem>>, vector<16x3xbf16>
    %cst_6 = arith.constant dense<0.000000e+00> : vector<16x256xf32>
    %7 = tpu.matmul %6, %5, %cst_6 {dimension_numbers = #tpu.dot_dimension_numbers<[1], [0], [0], [1], [0, 0, 1, 1], [], []>} : vector<16x3xbf16>, vector<3x256xbf16>, vector<16x256xf32> -> vector<16x256xf32>
    %c0_7 = arith.constant 0 : index
    %c0_8 = arith.constant 0 : index
    %8 = vector.load %arg4[%c0_7, %c0_8] : memref<16x1xf32, #tpu.memory_space<vmem>>, vector<16x1xf32>
    %9 = vector.broadcast %8 : vector<16x1xf32> to vector<16x256xf32>
    %10 = arith.addf %7, %9 : vector<16x256xf32>
    %cst_9 = arith.constant 0.000000e+00 : f32
    %11 = vector.broadcast %cst_9 : f32 to vector<16x256xf32>
    %12 = arith.maximumf %10, %11 : vector<16x256xf32>
    %13 = arith.truncf %12 : vector<16x256xf32> to vector<16x256xbf16>
    %c0_10 = arith.constant 0 : index
    %c0_11 = arith.constant 0 : index
    %c0_12 = arith.constant 0 : index
    %14 = vector.load %arg14[%c0_10, %c0_11, %c0_12] : memref<1x16x256xbf16, #tpu.memory_space<vmem>>, vector<1x16x256xbf16>
    %15 = vector.shape_cast %14 : vector<1x16x256xbf16> to vector<16x256xbf16>
    %16 = vector.shape_cast %13 : vector<16x256xbf16> to vector<1x16x256xbf16>
    tpu.vector_store %arg14[%c0_10, %c0_11, %c0_12], %16 {strides = array<i32>} : memref<1x16x256xbf16, #tpu.memory_space<vmem>>, vector<1x16x256xbf16>,
    %c0_13 = arith.constant 0 : index
    %c0_14 = arith.constant 0 : index
    %17 = vector.load %arg5[%c0_13, %c0_14] : memref<256x64xbf16, #tpu.memory_space<vmem>>, vector<256x64xbf16>
    %cst_15 = arith.constant dense<0.000000e+00> : vector<16x64xf32>
    %18 = tpu.matmul %13, %17, %cst_15 {dimension_numbers = #tpu.dot_dimension_numbers<[1], [0], [0], [1], [0, 0, 1, 1], [], []>} : vector<16x256xbf16>, vector<256x64xbf16>, vector<16x64xf32> -> vector<16x64xf32>
    %19 = arith.truncf %18 : vector<16x64xf32> to vector<16x64xbf16>
    %c0_16 = arith.constant 0 : index
    %c0_17 = arith.constant 0 : index
    %20 = vector.load %arg6[%c0_16, %c0_17] : memref<32x16xbf16, #tpu.memory_space<vmem>>, vector<32x16xbf16>
    %cst_18 = arith.constant dense<0.000000e+00> : vector<32x64xf32>
    %21 = tpu.matmul %20, %19, %cst_18 {dimension_numbers = #tpu.dot_dimension_numbers<[1], [0], [0], [1], [0, 0, 1, 1], [], []>} : vector<32x16xbf16>, vector<16x64xbf16>, vector<32x64xf32> -> vector<32x64xf32>
    %c0_19 = arith.constant 0 : index
    %c0_20 = arith.constant 0 : index
    %22 = vector.load %arg7[%c0_19, %c0_20] : memref<32x1xf32, #tpu.memory_space<vmem>>, vector<32x1xf32>
    %23 = vector.broadcast %22 : vector<32x1xf32> to vector<32x64xf32>
    %24 = arith.addf %21, %23 : vector<32x64xf32>
    %cst_21 = arith.constant 0.000000e+00 : f32
    %25 = vector.broadcast %cst_21 : f32 to vector<32x64xf32>
    %26 = arith.maximumf %24, %25 : vector<32x64xf32>
    %27 = arith.truncf %26 : vector<32x64xf32> to vector<32x64xbf16>
    %c0_22 = arith.constant 0 : index
    %c0_23 = arith.constant 0 : index
    %c0_24 = arith.constant 0 : index
    %28 = vector.load %arg15[%c0_22, %c0_23, %c0_24] : memref<1x32x64xbf16, #tpu.memory_space<vmem>>, vector<1x32x64xbf16>
    %29 = vector.shape_cast %28 : vector<1x32x64xbf16> to vector<32x64xbf16>
    %30 = vector.shape_cast %27 : vector<32x64xbf16> to vector<1x32x64xbf16>
    tpu.vector_store %arg15[%c0_22, %c0_23, %c0_24], %30 {strides = array<i32>} : memref<1x32x64xbf16, #tpu.memory_space<vmem>>, vector<1x32x64xbf16>,
    %c0_25 = arith.constant 0 : index
    %c0_26 = arith.constant 0 : index
    %31 = vector.load %arg8[%c0_25, %c0_26] : memref<64x16xbf16, #tpu.memory_space<vmem>>, vector<64x16xbf16>
    %cst_27 = arith.constant dense<0.000000e+00> : vector<32x16xf32>
    %32 = tpu.matmul %27, %31, %cst_27 {dimension_numbers = #tpu.dot_dimension_numbers<[1], [0], [0], [1], [0, 0, 1, 1], [], []>} : vector<32x64xbf16>, vector<64x16xbf16>, vector<32x16xf32> -> vector<32x16xf32>
    %33 = arith.truncf %32 : vector<32x16xf32> to vector<32x16xbf16>
    %c0_28 = arith.constant 0 : index
    %c0_29 = arith.constant 0 : index
    %34 = vector.load %arg9[%c0_28, %c0_29] : memref<48x32xbf16, #tpu.memory_space<vmem>>, vector<48x32xbf16>
    %cst_30 = arith.constant dense<0.000000e+00> : vector<48x16xf32>
    %35 = tpu.matmul %34, %33, %cst_30 {dimension_numbers = #tpu.dot_dimension_numbers<[1], [0], [0], [1], [0, 0, 1, 1], [], []>} : vector<48x32xbf16>, vector<32x16xbf16>, vector<48x16xf32> -> vector<48x16xf32>
    %c0_31 = arith.constant 0 : index
    %c0_32 = arith.constant 0 : index
    %36 = vector.load %arg10[%c0_31, %c0_32] : memref<48x1xf32, #tpu.memory_space<vmem>>, vector<48x1xf32>
    %37 = vector.broadcast %36 : vector<48x1xf32> to vector<48x16xf32>
    %38 = arith.addf %35, %37 : vector<48x16xf32>
    %cst_33 = arith.constant 0.000000e+00 : f32
    %39 = vector.broadcast %cst_33 : f32 to vector<48x16xf32>
    %40 = arith.maximumf %38, %39 : vector<48x16xf32>
    %41 = arith.truncf %40 : vector<48x16xf32> to vector<48x16xbf16>
    %c0_34 = arith.constant 0 : index
    %c0_35 = arith.constant 0 : index
    %c0_36 = arith.constant 0 : index
    %42 = vector.load %arg16[%c0_34, %c0_35, %c0_36] : memref<1x48x16xbf16, #tpu.memory_space<vmem>>, vector<1x48x16xbf16>
    %43 = vector.shape_cast %42 : vector<1x48x16xbf16> to vector<48x16xbf16>
    %44 = vector.shape_cast %41 : vector<48x16xbf16> to vector<1x48x16xbf16>
    tpu.vector_store %arg16[%c0_34, %c0_35, %c0_36], %44 {strides = array<i32>} : memref<1x48x16xbf16, #tpu.memory_space<vmem>>, vector<1x48x16xbf16>,
    %c0_37 = arith.constant 0 : index
    %c0_38 = arith.constant 0 : index
    %45 = vector.load %arg11[%c0_37, %c0_38] : memref<16x4xbf16, #tpu.memory_space<vmem>>, vector<16x4xbf16>
    %cst_39 = arith.constant dense<0.000000e+00> : vector<48x4xf32>
    %46 = tpu.matmul %41, %45, %cst_39 {dimension_numbers = #tpu.dot_dimension_numbers<[1], [0], [0], [1], [0, 0, 1, 1], [], []>} : vector<48x16xbf16>, vector<16x4xbf16>, vector<48x4xf32> -> vector<48x4xf32>
    %47 = arith.truncf %46 : vector<48x4xf32> to vector<48x4xbf16>
    %c0_40 = arith.constant 0 : index
    %c0_41 = arith.constant 0 : index
    %48 = vector.load %arg12[%c0_40, %c0_41] : memref<64x48xbf16, #tpu.memory_space<vmem>>, vector<64x48xbf16>
    %cst_42 = arith.constant dense<0.000000e+00> : vector<64x4xf32>
    %49 = tpu.matmul %48, %47, %cst_42 {dimension_numbers = #tpu.dot_dimension_numbers<[1], [0], [0], [1], [0, 0, 1, 1], [], []>} : vector<64x48xbf16>, vector<48x4xbf16>, vector<64x4xf32> -> vector<64x4xf32>
    %c0_43 = arith.constant 0 : index
    %c0_44 = arith.constant 0 : index
    %50 = vector.load %arg13[%c0_43, %c0_44] : memref<64x1xf32, #tpu.memory_space<vmem>>, vector<64x1xf32>
    %51 = vector.broadcast %50 : vector<64x1xf32> to vector<64x4xf32>
    %52 = arith.addf %49, %51 : vector<64x4xf32>
    %cst_45 = arith.constant 0.000000e+00 : f32
    %53 = vector.broadcast %cst_45 : f32 to vector<64x4xf32>
    %54 = arith.maximumf %52, %53 : vector<64x4xf32>
    %55 = arith.truncf %54 : vector<64x4xf32> to vector<64x4xbf16>
    %c0_46 = arith.constant 0 : index
    %c0_47 = arith.constant 0 : index
    %c0_48 = arith.constant 0 : index
    %56 = vector.load %arg17[%c0_46, %c0_47, %c0_48] : memref<1x64x4xbf16, #tpu.memory_space<vmem>>, vector<1x64x4xbf16>
    %57 = vector.shape_cast %56 : vector<1x64x4xbf16> to vector<64x4xbf16>
    %58 = vector.shape_cast %55 : vector<64x4xbf16> to vector<1x64x4xbf16>
    tpu.vector_store %arg17[%c0_46, %c0_47, %c0_48], %58 {strides = array<i32>} : memref<1x64x4xbf16, #tpu.memory_space<vmem>>, vector<1x64x4xbf16>,
    return
  }
  func.func @transform_0(%arg0: i32) -> (i32, i32, i32) {
    %c0_i32 = arith.constant 0 : i32
    %c0_i32_0 = arith.constant 0 : i32
    %c0_i32_1 = arith.constant 0 : i32
    return %arg0, %c0_i32, %c0_i32_0 : i32, i32, i32
  }
  func.func @transform_1(%arg0: i32) -> (i32, i32) {
    %c0_i32 = arith.constant 0 : i32
    %c0_i32_0 = arith.constant 0 : i32
    %c0_i32_1 = arith.constant 0 : i32
    return %c0_i32, %c0_i32_0 : i32, i32
  }
  func.func @transform_2(%arg0: i32) -> (i32, i32) {
    %c0_i32 = arith.constant 0 : i32
    %c0_i32_0 = arith.constant 0 : i32
    %c0_i32_1 = arith.constant 0 : i32
    return %c0_i32, %c0_i32_0 : i32, i32
  }
  func.func @transform_3(%arg0: i32) -> (i32, i32) {
    %c0_i32 = arith.constant 0 : i32
    %c0_i32_0 = arith.constant 0 : i32
    %c0_i32_1 = arith.constant 0 : i32
    return %c0_i32, %c0_i32_0 : i32, i32
  }
  func.func @transform_4(%arg0: i32) -> (i32, i32) {
    %c0_i32 = arith.constant 0 : i32
    %c0_i32_0 = arith.constant 0 : i32
    %c0_i32_1 = arith.constant 0 : i32
    return %c0_i32, %c0_i32_0 : i32, i32
  }
  func.func @transform_5(%arg0: i32) -> (i32, i32) {
    %c0_i32 = arith.constant 0 : i32
    %c0_i32_0 = arith.constant 0 : i32
    %c0_i32_1 = arith.constant 0 : i32
    return %c0_i32, %c0_i32_0 : i32, i32
  }
  func.func @transform_6(%arg0: i32) -> (i32, i32) {
    %c0_i32 = arith.constant 0 : i32
    %c0_i32_0 = arith.constant 0 : i32
    %c0_i32_1 = arith.constant 0 : i32
    return %c0_i32, %c0_i32_0 : i32, i32
  }
  func.func @transform_7(%arg0: i32) -> (i32, i32) {
    %c0_i32 = arith.constant 0 : i32
    %c0_i32_0 = arith.constant 0 : i32
    %c0_i32_1 = arith.constant 0 : i32
    return %c0_i32, %c0_i32_0 : i32, i32
  }
  func.func @transform_8(%arg0: i32) -> (i32, i32) {
    %c0_i32 = arith.constant 0 : i32
    %c0_i32_0 = arith.constant 0 : i32
    %c0_i32_1 = arith.constant 0 : i32
    return %c0_i32, %c0_i32_0 : i32, i32
  }
  func.func @transform_9(%arg0: i32) -> (i32, i32) {
    %c0_i32 = arith.constant 0 : i32
    %c0_i32_0 = arith.constant 0 : i32
    %c0_i32_1 = arith.constant 0 : i32
    return %c0_i32, %c0_i32_0 : i32, i32
  }
  func.func @transform_10(%arg0: i32) -> (i32, i32) {
    %c0_i32 = arith.constant 0 : i32
    %c0_i32_0 = arith.constant 0 : i32
    %c0_i32_1 = arith.constant 0 : i32
    return %c0_i32, %c0_i32_0 : i32, i32
  }
  func.func @transform_11(%arg0: i32) -> (i32, i32) {
    %c0_i32 = arith.constant 0 : i32
    %c0_i32_0 = arith.constant 0 : i32
    %c0_i32_1 = arith.constant 0 : i32
    return %c0_i32, %c0_i32_0 : i32, i32
  }
  func.func @transform_12(%arg0: i32) -> (i32, i32) {
    %c0_i32 = arith.constant 0 : i32
    %c0_i32_0 = arith.constant 0 : i32
    %c0_i32_1 = arith.constant 0 : i32
    return %c0_i32, %c0_i32_0 : i32, i32
  }
  func.func @transform_13(%arg0: i32) -> (i32, i32, i32) {
    %c0_i32 = arith.constant 0 : i32
    %c0_i32_0 = arith.constant 0 : i32
    %c0_i32_1 = arith.constant 0 : i32
    return %arg0, %c0_i32, %c0_i32_0 : i32, i32, i32
  }
  func.func @transform_14(%arg0: i32) -> (i32, i32, i32) {
    %c0_i32 = arith.constant 0 : i32
    %c0_i32_0 = arith.constant 0 : i32
    %c0_i32_1 = arith.constant 0 : i32
    return %arg0, %c0_i32, %c0_i32_0 : i32, i32, i32
  }
  func.func @transform_15(%arg0: i32) -> (i32, i32, i32) {
    %c0_i32 = arith.constant 0 : i32
    %c0_i32_0 = arith.constant 0 : i32
    %c0_i32_1 = arith.constant 0 : i32
    return %arg0, %c0_i32, %c0_i32_0 : i32, i32, i32
  }
  func.func @transform_16(%arg0: i32) -> (i32, i32, i32) {
    %c0_i32 = arith.constant 0 : i32
    %c0_i32_0 = arith.constant 0 : i32
    %c0_i32_1 = arith.constant 0 : i32
    return %arg0, %c0_i32, %c0_i32_0 : i32, i32, i32
  }
}

</mosaic_0001>

<bundles_post_ra>
// kernel: tpu_custom_call.1
= control target key start
LH: loop header
LB: loop body
LE: loop exit
PB: predicated region body
PF: predicated region fallthrough
CT: control target
= control target key end

     0   :  { %s3968_s0 = inlined_call_operand.vmem [shape: f32[2,3,1024], index: 0, kind: input, shape index: {}]   ;;  %s3969_s1 = inlined_call_operand.hbm [shape: bf16[1024,256], index: 1, kind: input, shape index: {}]   ;;  %s3970_s2 = inlined_call_operand.vmem [shape: bf16[16,3], index: 2, kind: input, shape index: {}]   ;;  %s3971_s3 = inlined_call_operand.vmem [shape: f32[16,1], index: 3, kind: input, shape index: {}]   ;;  %s3972_s4 = inlined_call_operand.vmem [shape: bf16[256,64], index: 4, kind: input, shape index: {}]   ;;  %s3973_s5 = inlined_call_operand.vmem [shape: bf16[32,16], index: 5, kind: input, shape index: {}]   ;;  %s3974_s6 = inlined_call_operand.vmem [shape: f32[32,1], index: 6, kind: input, shape index: {}]   ;;  %s3975_s7 = inlined_call_operand.vmem [shape: bf16[64,16], index: 7, kind: input, shape index: {}]   ;;  %s3976_s8 = inlined_call_operand.vmem [shape: bf16[48,32], index: 8, kind: input, shape index: {}]   ;;  %s3977_s9 = inlined_call_operand.vmem [shape: f32[48,1], index: 9, kind: input, shape index: {}]   ;;  %s3978_s10 = inlined_call_operand.vmem [shape: bf16[16,4], index: 10, kind: input, shape index: {}]   ;;  %s3979_s11 = inlined_call_operand.vmem [shape: bf16[64,48], index: 11, kind: input, shape index: {}]   ;;  %s3980_s12 = inlined_call_operand.vmem [shape: f32[64,1], index: 12, kind: input, shape index: {}]   ;;  %s3981_s13 = inlined_call_operand.hbm [shape: bf16[2,16,256], index: 13, kind: output, shape index: {0}]   ;;  %s3982_s14 = inlined_call_operand.hbm [shape: bf16[2,32,64], index: 14, kind: output, shape index: {1}]   ;;  %s3983_s15 = inlined_call_operand.vmem [shape: bf16[2,48,16], index: 15, kind: output, shape index: {2}]   ;;  %s3984_s16 = inlined_call_operand.vmem [shape: bf16[2,64,4], index: 16, kind: output, shape index: {3}]  }
   0x1   :  { %3995 = sst [smem:[#allocation16_spill]] %s3968_s0 }
   0x2   :  { %3996 = sst [smem:[#allocation17_spill]] %s3969_s1 }
   0x3   :  { %3997 = sst [smem:[#allocation18_spill]] %s3970_s2 }
   0x4   :  { %3998 = sst [smem:[#allocation19_spill]] %s3971_s3 }
   0x5   :  { %3999 = sst [smem:[#allocation20_spill]] %s3972_s4 }
   0x6   :  { %22 = vsyncpa [#allocation3], 0 }
   0x7   :  { %23 = vsyncpa [#allocation4], 0 }
   0x8   :  { %25 = vsyncpa [#allocation4 + $0x1], 0 }
   0x9   :  { %26 = vsyncpa [#allocation7], 0 }
   0xa   :  { %28 = vsyncpa [#allocation7 + $0x1], 0  ;;  %s3529_s21 = smov 0   ;;  %s3531_s22 = smov 0  }
   0xb   :  { %s3533_s23 = smov 0   ;;  %s3535_s24 = smov 0  }
   0xc LB: > { %4000 = sst [smem:[#allocation11_spill]] %s3417_s21  ;;  %s3550_s25 = sadd.s32 4294967295, %s3429_s24   ;;  %s3429_s24 = sphi %s3535_s24, %s4023_s24   ;;  %s3425_s23 = sphi %s3533_s23, %s4025_s23   ;;  %s3421_s22 = sphi %s3531_s22, %s4027_s22   ;;  %s3417_s21 = sphi %s3529_s21, %s4026_s21  }
   0xd   : > { %4001 = sst [smem:[#allocation12_spill]] %s3425_s23  ;;  %s2650_s26 = sadd.s32 4294967294, %s3429_s24  }
   0xe   : > { %s3554_s27 = sadd.s32 1, %s3429_s24   ;;  %s319_s28 = sadd.s32 1, %s3425_s23 }
   0xf   : > { %4002 = sst [smem:[#allocation13_spill]] %s3554_s27  ;;  %s316_s29 = ssub.s32 %s3429_s24, %s3554_s27 }
  0x10   : > { %p329_p0 = scmp.ne.s32.totalorder %s3425_s23, %s3421_s22  ;;  %p317_p1 = scmp.eq.s32.totalorder %s316_s29, 0 }
  0x11   : > { %p330_p2 = scmp.eq.s32.totalorder %s3550_s25, 1  ;;  %p335_p3 = scmp.ne.s32.totalorder %s3421_s22, %s3417_s21 }
  0x12   : > { %p336_p4 = scmp.eq.s32.totalorder %s2650_s26, 1  ;;  %p2651_p7 = scmp.ge.s32.totalorder %s3429_s24, 1 }
  0x13   : > { %s3565_s30 = scalar_select %p317_p1, %s3425_s23, %s319_s28  }
  0x14   : > { %p3567_p5 = por %p330_p2, %p329_p0  ;;  %p3571_p6 = por %p336_p4, %p335_p3 }
  0x15   : > { %4003 = sst [smem:[#allocation14_spill]] %s3565_s30  ;;  %p421_p8 = scmp.lt.s32.totalorder %s3429_s24, 3 }
  0x16   : > { %s4004_s0 = scalar_select %p3567_p5, 1, 0 }
  0x17   : > { %s4005_s17 = scalar_select %p3571_p6, 1, 0 }
  0x18   : > { %p3990_p9 = scmp.eq.s32.totalorder %s3550_s25, 0  ;;  %p3578_p10 = pnand %p2651_p7, %p421_p8 }
  0x19   : > { %4006 = sst [smem:[#allocation15_spill]] %s4005_s17  ;;  %s3431_s19 = smov [#allocation2]  }
  0x1a   : > { %s4007_s18 = scalar_select %p3578_p10, 1, 0 }
  0x1b   : > { %s433_s20 = sshll.u32 %s3431_s19, 4  ;;  %p3017_p11 = pneg %p3578_p10  ;;  %s434_s20 = int_to_ptr.vmem [resolvable:$true] %s433_s20 }
  0x1c   : > { %s4009_s1 = sld [smem:[#allocation17_spill]] }
  0x1d   : > { %p3586_p12 = pnand %p3990_p9, %p3017_p11 }
  0x1f   : > { %p3305_p0 = pneg %p3586_p12 }
  0x22   : > { %s3303_s30 = scalar_lea.hbm %s4009_s1, 16384 }
  0x23   : > { %p3304_p13 = scmp.ne.s32.totalorder %s4009_s1, %s3303_s30  ;;  %p3310_p3 = scmp.lt.u32.totalorder %s3303_s30, %s4009_s1 }
  0x25   : > { %p3306_p1 = pnand %p3305_p0, %p3304_p13 }
  0x27   : > { %p3307_p2 = pneg %p3306_p1 }
  0x29   : > { %p3312_p4 = pnand %p3310_p3, %p3307_p2 }
  0x2b   : > { %3315 = shalt.err (!%p3312_p4)
}
  0x2c   : > { %s3316_s21 = scalar_lea.vmem %s434_s20, 16384  ;;  %p3324_p9 = scmp.lt.s32.totalorder %s434_s20, %s434_s20 }
  0x2d   : > { %p3317_p7 = scmp.ne.s32.totalorder %s434_s20, %s3316_s21  ;;  %p3325_p6 = scmp.lt.s32.totalorder %s3316_s21, %s3316_s21 }
  0x2f   : > { %p3319_p8 = pnand %p3317_p7, %p3305_p0  ;;  %p3326_p5 = por %p3325_p6, %p3324_p9 }
  0x31   : > { %p3320_p11 = pneg %p3319_p8 }
  0x33   : > { %p3327_p10 = pnand %p3326_p5, %p3320_p11 }
  0x35   : > { %3330 = shalt.err (!%p3327_p10)
}
  0x36   : > { %s3432_s23 = smov 128   ;;  %s3433_s27 = smov 8  }
  0x37   : > { %3020 = dma.hbm_to_vmem [thread:$0]  (!%p3586_p12), %s4009_s1, 16384, %s434_s20, [#allocation3], %s3432_s23, %s3432_s23, %s3433_s27  }
  0x38   : > { %p4010_p13 = scmp.ne.s32.totalorder %s4007_s18, 0 }
  0x39   : > { %p4011_p1 = scmp.eq.s32.totalorder (!%p4010_p13), %s3550_s25, 0 }
  0x3a   : > { %490 = sbr.rel (%p4010_p13) target bundleno = 2059 (0x80b), region = 72 }
  0x41   : > { %3404 = dma.done.wait (%p4011_p1), [#allocation3], 16384   ;;  %p4012_p0 = pmov %p4011_p1 }
  0x42   : > { %v3076_v0 = vld [vmem:[#allocation2 + $0x104] ss:$8 sps:$4 sm:$0xff]   ;;  %v3078_v1 = vld [vmem:[#allocation2 + $0x100] ss:$8 sps:$4 sm:$0xff]   ;;  %v3079_v2 = vld [vmem:[#allocation2 + $0x114] ss:$8 sps:$4 sm:$0xff]  }
  0x43   : > { %3406 = vsyncadd (%p4012_p0), [#allocation3], 4294950912  ;;  %1404 = vmatprep.subr.bf16.mxu0 %v3076_v0  ;;  %v3081_v3 = vld [vmem:[#allocation2 + $0x110] ss:$8 sps:$4 sm:$0xff]   ;;  %v3082_v4 = vld [vmem:[#allocation2 + $0x124] ss:$8 sps:$4 sm:$0xff]  }
  0x44   : > { %1405 = vmatpush1.bf16.msra.mxu0 %v3078_v1  ;;  %v3084_v5 = vld [vmem:[#allocation2 + $0x120] ss:$8 sps:$4 sm:$0xff]   ;;  %p555_p5 = scmp.lt.s32.totalorder %s3550_s25, 1  ;;  %v3085_v6 = vld [vmem:[#allocation2 + $0x134] ss:$8 sps:$4 sm:$0xff]   ;;  %s4013_s20 = sld [smem:[#allocation16_spill]] }
  0x45   : > { %1406 = vmatprep.subr.bf16.mxu0 %v3079_v2  ;;  %v3087_v7 = vld [vmem:[#allocation2 + $0x130] ss:$8 sps:$4 sm:$0xff]   ;;  %v3088_v8 = vld [vmem:[#allocation2 + $0x144] ss:$8 sps:$4 sm:$0xff]   ;;  %v3090_v9 = vld [vmem:[#allocation2 + $0x140] ss:$8 sps:$4 sm:$0xff]  }
  0x46   : > { %s3614_s21 = scalar_select %p555_p5, %s3550_s25, 1  ;;  %v3091_v10 = vld [vmem:[#allocation2 + $0x154] ss:$8 sps:$4 sm:$0xff]   ;;  %v3093_v11 = vld [vmem:[#allocation2 + $0x150] ss:$8 sps:$4 sm:$0xff]   ;;  %vm1552_vm0 = vcmask 1040384  }
  0x47   : > { %v3094_v12 = vld [vmem:[#allocation2 + $0x164] ss:$8 sps:$4 sm:$0xff]   ;;  %v3096_v15 = vld [vmem:[#allocation2 + $0x160] ss:$8 sps:$4 sm:$0xff]   ;;  %v3097_v16 = vld [vmem:[#allocation2 + $0x174] ss:$8 sps:$4 sm:$0xff]  }
  0x48   : > { %1407 = vmatpush1.bf16.msra.mxu0 %v3081_v3  ;;  %s3993_s30 = sshll.u32 %s3614_s21, 5  ;;  %v3099_v18 = vld [vmem:[#allocation2 + $0x170] ss:$8 sps:$4 sm:$0xff]   ;;  %v3100_v19 = vld [vmem:[#allocation2 + $0x184] ss:$8 sps:$4 sm:$0xff]   ;;  %s4014_s3 = sld [smem:[#allocation19_spill]] }
  0x49   : > { %1408 = vmatprep.subr.bf16.mxu0 %v3082_v4  ;;  %v3102_v20 = vld [vmem:[#allocation2 + $0x180] ss:$8 sps:$4 sm:$0xff]   ;;  %v3103_v21 = vld [vmem:[#allocation2 + $0x194] ss:$8 sps:$4 sm:$0xff]   ;;  %v3105_v22 = vld [vmem:[#allocation2 + $0x190] ss:$8 sps:$4 sm:$0xff]  }
  0x4a   : > { %s3622_s26 = scalar_lea.vmem %s4013_s20, %s3993_s30  ;;  %v3106_v23 = vld [vmem:[#allocation2 + $0x1a4] ss:$8 sps:$4 sm:$0xff]   ;;  %v3108_v24 = vld [vmem:[#allocation2 + $0x1a0] ss:$8 sps:$4 sm:$0xff]   ;;  %v3109_v25 = vld [vmem:[#allocation2 + $0x1b4] ss:$8 sps:$4 sm:$0xff]  }
  0x4b   : > { %v3625_v13 = vld [vmem:[%s3622_s26 + $0x8] sm:$0x77]  ;;  %v3111_v26 = vld [vmem:[#allocation2 + $0x1b0] ss:$8 sps:$4 sm:$0xff]   ;;  %v3180_v31 = vld [vmem:[#allocation2 + $0x14] ss:$8 sps:$4 sm:$0xff]  }
  0x4c   : > { %1409 = vmatpush1.bf16.msra.mxu0 %v3084_v5  ;;  %v580_v14 = vcombine.high %v3625_v13, %v3625_v13  ;;  %v3173_v27 = vld [vmem:[#allocation2 + $0x4] ss:$8 sps:$4 sm:$0xff]   ;;  %v3175_v29 = vld [vmem:[#allocation2] ss:$8 sps:$4 sm:$0xff]   ;;  %v3182_v32 = vld [vmem:[#allocation2 + $0x10] ss:$8 sps:$4 sm:$0xff]   ;;  %v589_v49 = vpack.c.bf16 %v3625_v13, %v3625_v13 }
  0x4d   : > { %1410 = vmatprep.subr.bf16.mxu0 %v3085_v6  ;;  %v3112_v28 = vld [vmem:[#allocation2 + $0x1c4] ss:$8 sps:$4 sm:$0xff]   ;;  %v3114_v30 = vld [vmem:[#allocation2 + $0x1c0] ss:$8 sps:$4 sm:$0xff]   ;;  %1363 = vmatprep.subr.bf16.mxu1 %v3173_v27  ;;  %v3115_v33 = vld [vmem:[#allocation2 + $0x1d4] ss:$8 sps:$4 sm:$0xff]  }
  0x4e   : > { %v590_v17 = vpack.c.bf16 %v580_v14, %v580_v14  ;;  %1364 = vmatpush1.bf16.msra.mxu1 %v3175_v29  ;;  %v3186_v34 = vld [vmem:[#allocation2 + $0x24] ss:$8 sps:$4 sm:$0xff]   ;;  %v3188_v35 = vld [vmem:[#allocation2 + $0x20] ss:$8 sps:$4 sm:$0xff]   ;;  %v3117_v36 = vld [vmem:[#allocation2 + $0x1d0] ss:$8 sps:$4 sm:$0xff]  }
  0x4f   : > { %1365 = vmatprep.subr.bf16.mxu1 %v3180_v31  ;;  %v3118_v37 = vld [vmem:[#allocation2 + $0x1e4] ss:$8 sps:$4 sm:$0xff]   ;;  %v3192_v38 = vld [vmem:[#allocation2 + $0x34] ss:$8 sps:$4 sm:$0xff]   ;;  %v3120_v39 = vld [vmem:[#allocation2 + $0x1e0] ss:$8 sps:$4 sm:$0xff]  }
  0x50   : > { %1411 = vmatpush1.bf16.msra.mxu0 %v3087_v7  ;;  %1436 = vmatprep.mubr.bf16.mxu0 %v590_v17  ;;  %v3194_v40 = vld [vmem:[#allocation2 + $0x30] ss:$8 sps:$4 sm:$0xff]   ;;  %v3198_v41 = vld [vmem:[#allocation2 + $0x44] ss:$8 sps:$4 sm:$0xff]   ;;  %v3121_v42 = vld [vmem:[#allocation2 + $0x1f4] ss:$8 sps:$4 sm:$0xff]  }
  0x51   : > { %1412 = vmatprep.subr.bf16.mxu0 %v3088_v8  ;;  %v3630_v43 = vld [vmem:[%s3622_s26 + $0x10] sm:$0x77]  ;;  %v3200_v45 = vld [vmem:[#allocation2 + $0x40] ss:$8 sps:$4 sm:$0xff]   ;;  %v3127_v48 = vld [vmem:[#allocation2 + $0x204] ss:$8 sps:$4 sm:$0xff]  }
  0x52   : > { %1366 = vmatpush1.bf16.msra.mxu1 %v3182_v32  ;;  %v3123_v44 = vld [vmem:[#allocation2 + $0x1f0] ss:$8 sps:$4 sm:$0xff]   ;;  %v581_v46 = vcombine.high %v3630_v43, %v3630_v43  ;;  %v3204_v47 = vld [vmem:[#allocation2 + $0x54] ss:$8 sps:$4 sm:$0xff]   ;;  %v3125_v51 = vld [vmem:[#allocation2 + $0x200] ss:$8 sps:$4 sm:$0xff]  }
  0x53   : > { %1367 = vmatprep.subr.bf16.mxu1 %v3186_v34  ;;  %v3206_v50 = vld [vmem:[#allocation2 + $0x50] ss:$8 sps:$4 sm:$0xff]   ;;  %v3130_v53 = vld [vmem:[#allocation2 + $0x214] ss:$8 sps:$4 sm:$0xff]   ;;  %v3210_v54 = vld [vmem:[#allocation2 + $0x64] ss:$8 sps:$4 sm:$0xff]  }
  0x54   : > { %1413 = vmatpush1.bf16.msra.mxu0 %v3090_v9  ;;  %v592_v52 = vpack.c.bf16 %v581_v46, %v581_v46  ;;  %v3128_v55 = vld [vmem:[#allocation2 + $0x210] ss:$8 sps:$4 sm:$0xff]   ;;  %v3212_v56 = vld [vmem:[#allocation2 + $0x60] ss:$8 sps:$4 sm:$0xff]   ;;  %v3216_v57 = vld [vmem:[#allocation2 + $0x74] ss:$8 sps:$4 sm:$0xff]  }
  0x55   : > { %1414 = vmatprep.subr.bf16.mxu0 %v3091_v10  ;;  %v3133_v58 = vld [vmem:[#allocation2 + $0x224] ss:$8 sps:$4 sm:$0xff]   ;;  %v3131_v59 = vld [vmem:[#allocation2 + $0x220] ss:$8 sps:$4 sm:$0xff]   ;;  %v3218_v60 = vld [vmem:[#allocation2 + $0x70] ss:$8 sps:$4 sm:$0xff]  }
  0x56   : > { %1368 = vmatpush1.bf16.msra.mxu1 %v3188_v35  ;;  %v3222_v61 = vld [vmem:[#allocation2 + $0x84] ss:$8 sps:$4 sm:$0xff]   ;;  %v3136_v62 = vld [vmem:[#allocation2 + $0x234] ss:$8 sps:$4 sm:$0xff]   ;;  %v3134_v63 = vld [vmem:[#allocation2 + $0x230] ss:$8 sps:$4 sm:$0xff]  }
  0x57   : > { %1369 = vmatprep.subr.bf16.mxu1 %v3192_v38  ;;  %v3224_v0 = vld [vmem:[#allocation2 + $0x80] ss:$8 sps:$4 sm:$0xff]   ;;  %v3228_v1 = vld [vmem:[#allocation2 + $0x94] ss:$8 sps:$4 sm:$0xff]   ;;  %v3139_v2 = vld [vmem:[#allocation2 + $0x244] ss:$8 sps:$4 sm:$0xff]  }
  0x58   : > { %1415 = vmatpush1.bf16.msra.mxu0 %v3093_v11  ;;  %v3137_v3 = vld [vmem:[#allocation2 + $0x240] ss:$8 sps:$4 sm:$0xff]   ;;  %v3230_v4 = vld [vmem:[#allocation2 + $0x90] ss:$8 sps:$4 sm:$0xff]   ;;  %v3234_v5 = vld [vmem:[#allocation2 + $0xa4] ss:$8 sps:$4 sm:$0xff]  }
  0x59   : > { %1416 = vmatprep.subr.bf16.mxu0 %v3094_v12  ;;  %v3142_v6 = vld [vmem:[#allocation2 + $0x254] ss:$8 sps:$4 sm:$0xff]   ;;  %v3140_v7 = vld [vmem:[#allocation2 + $0x250] ss:$8 sps:$4 sm:$0xff]   ;;  %v3236_v8 = vld [vmem:[#allocation2 + $0xa0] ss:$8 sps:$4 sm:$0xff]  }
  0x5a   : > { %1370 = vmatpush1.bf16.msra.mxu1 %v3194_v40  ;;  %v3240_v9 = vld [vmem:[#allocation2 + $0xb4] ss:$8 sps:$4 sm:$0xff]   ;;  %v3145_v10 = vld [vmem:[#allocation2 + $0x264] ss:$8 sps:$4 sm:$0xff]   ;;  %v3143_v12 = vld [vmem:[#allocation2 + $0x260] ss:$8 sps:$4 sm:$0xff]  }
  0x5b   : > { %1371 = vmatprep.subr.bf16.mxu1 %v3198_v41  ;;  %v571_v11 = vld [vmem:[%s3622_s26] sm:$0x77]  ;;  %v3148_v14 = vld [vmem:[#allocation2 + $0x274] ss:$8 sps:$4 sm:$0xff]   ;;  %v3152_v27 = vld [vmem:[#allocation2 + $0x290] ss:$8 sps:$4 sm:$0xff]  }
  0x5c   : > { %1417 = vmatpush1.bf16.msra.mxu0 %v3096_v15  ;;  %v579_v13 = vcombine.high %v571_v11, %v571_v11  ;;  %v3242_v15 = vld [vmem:[#allocation2 + $0xb0] ss:$8 sps:$4 sm:$0xff]   ;;  %v3157_v29 = vld [vmem:[#allocation2 + $0x2a4] ss:$8 sps:$4 sm:$0xff]   ;;  %v3155_v31 = vld [vmem:[#allocation2 + $0x2a0] ss:$8 sps:$4 sm:$0xff]  }
  0x5d   : > { %1418 = vmatprep.subr.bf16.mxu0 %v3097_v16  ;;  %v3246_v16 = vld [vmem:[#allocation2 + $0xc4] ss:$8 sps:$4 sm:$0xff]   ;;  %v3160_v32 = vld [vmem:[#allocation2 + $0x2b4] ss:$8 sps:$4 sm:$0xff]   ;;  %v3158_v34 = vld [vmem:[#allocation2 + $0x2b0] ss:$8 sps:$4 sm:$0xff]  }
  0x5e   : > { %1372 = vmatpush1.bf16.msra.mxu1 %v3200_v45  ;;  %v588_v17 = vpack.c.bf16 %v579_v13, %v579_v13  ;;  %v3163_v35 = vld [vmem:[#allocation2 + $0x2c4] ss:$8 sps:$4 sm:$0xff]   ;;  %v3164_v38 = vld [vmem:[#allocation2 + $0x2d0] ss:$8 sps:$4 sm:$0xff]   ;;  %v3167_v40 = vld [vmem:[#allocation2 + $0x2e0] ss:$8 sps:$4 sm:$0xff]  }
  0x5f   : > { %1373 = vmatprep.subr.bf16.mxu1 %v3204_v47  ;;  %v3172_v41 = vld [vmem:[#allocation2 + $0x2f4] ss:$8 sps:$4 sm:$0xff]   ;;  %v3179_v46 = vld [vmem:[#allocation2 + $0x304] ss:$8 sps:$4 sm:$0xff]   ;;  %v591_v47 = vpack.c.bf16 %v3630_v43, %v3630_v43  ;;  %v3201_v43 = vld [vmem:[#allocation2 + $0x340] ss:$8 sps:$4 sm:$0xff]  }
  0x60   : > { %1419 = vmatpush1.bf16.msra.mxu0 %v3099_v18  ;;  %v3248_v18 = vld [vmem:[#allocation2 + $0xc0] ss:$8 sps:$4 sm:$0xff]   ;;  %1395 = vmatprep.mubr.bf16.mxu1 %v588_v17  ;;  %v3270_v13 = vld [vmem:[#allocation2 + $0x3f4] ss:$8 sps:$4 sm:$0xff]   ;;  %vm1553_vm1 = vcmask 1041408   ;;  %s4015_s4 = sld [smem:[#allocation20_spill]] }
  0x61   : > { %1420 = vmatprep.subr.bf16.mxu0 %v3100_v19  ;;  %v3146_v19 = vld [vmem:[#allocation2 + $0x270] ss:$8 sps:$4 sm:$0xff]   ;;  %v1531_v17 = vld [vmem:[%s4014_s3] sm:$0xff]  ;;  %s4016_s2 = sld [smem:[#allocation18_spill]]  ;;  %vm1548_vm2 = vcmask 23552   ;;  %s3728_s29 = sand.u32 1, %s3421_s22  }
  0x62   : > { %1374 = vmatpush1.bf16.msra.mxu1 %v3206_v50  ;;  %v3185_v50 = vld [vmem:[#allocation2 + $0x314] ss:$8 sps:$4 sm:$0xff]   ;;  %s3994_s17 = sshll.u32 %s3728_s29, 4  ;;  %vm1831_vm3 = vcmask 130048   ;;  %vm1907_vm4 = vcmask 519168   ;;  %vm1944_vm5 = vcmask 523264  }
  0x63   : > { %1375 = vmatprep.subr.bf16.mxu1 %v3210_v54  ;;  %v3197_v54 = vld [vmem:[#allocation2 + $0x334] ss:$8 sps:$4 sm:$0xff]   ;;  %s3733_s18 = scalar_lea.vmem [#allocation5], %s3994_s17  ;;  %vm3437_vm6 = vmmov 0   ;;  %vm2059_vm7 = vcmask 261120   ;;  %vm2156_vm8 = vcmask 125952  }
  0x64   : > { %1421 = vmatpush1.bf16.msra.mxu0 %v3102_v20  ;;  %v3252_v20 = vld [vmem:[#allocation2 + $0xd4] ss:$8 sps:$4 sm:$0xff]   ;;  %vm2316_vm9 = vcmask 392192   ;;  %s2887_s20 = sshll.u32 %s3550_s25, 8  ;;  %p4018_p9 = scmp.ne.s32.totalorder %s4004_s0, 0 }
  0x65   : > { %1422 = vmatprep.subr.bf16.mxu0 %v3103_v21  ;;  %v3151_v21 = vld [vmem:[#allocation2 + $0x284] ss:$8 sps:$4 sm:$0xff]   ;;  %s3878_s27 = scalar_lea.hbm %s3982_s14, %s2887_s20 }
  0x66   : > { %1376 = vmatpush1.bf16.msra.mxu1 %v3212_v56  ;;  %v3203_v56 = vld [vmem:[#allocation2 + $0x344] ss:$8 sps:$4 sm:$0xff]  }
  0x67   : > { %1377 = vmatprep.subr.bf16.mxu1 %v3216_v57  ;;  %v3209_v57 = vld [vmem:[#allocation2 + $0x354] ss:$8 sps:$4 sm:$0xff]  }
  0x68   : > { %1423 = vmatpush1.bf16.msra.mxu0 %v3105_v22  ;;  %v3254_v22 = vld [vmem:[#allocation2 + $0xd0] ss:$8 sps:$4 sm:$0xff]  }
  0x69   : > { %1424 = vmatprep.subr.bf16.mxu0 %v3106_v23  ;;  %v3149_v23 = vld [vmem:[#allocation2 + $0x280] ss:$8 sps:$4 sm:$0xff]  }
  0x6a   : > { %1378 = vmatpush1.bf16.msra.mxu1 %v3218_v60  ;;  %v3213_v60 = vld [vmem:[#allocation2 + $0x360] ss:$8 sps:$4 sm:$0xff]  }
  0x6b   : > { %1379 = vmatprep.subr.bf16.mxu1 %v3222_v61  ;;  %v3221_v61 = vld [vmem:[#allocation2 + $0x374] ss:$8 sps:$4 sm:$0xff]  }
  0x6c   : > { %1425 = vmatpush1.bf16.msra.mxu0 %v3108_v24  ;;  %v3258_v24 = vld [vmem:[#allocation2 + $0xe4] ss:$8 sps:$4 sm:$0xff]  }
  0x6d   : > { %1426 = vmatprep.subr.bf16.mxu0 %v3109_v25  ;;  %v3154_v25 = vld [vmem:[#allocation2 + $0x294] ss:$8 sps:$4 sm:$0xff]  }
  0x6e   : > { %1380 = vmatpush1.bf16.msra.mxu1 %v3224_v0  ;;  %v3225_v0 = vld [vmem:[#allocation2 + $0x380] ss:$8 sps:$4 sm:$0xff]  }
  0x6f   : > { %1381 = vmatprep.subr.bf16.mxu1 %v3228_v1  ;;  %v3233_v1 = vld [vmem:[#allocation2 + $0x394] ss:$8 sps:$4 sm:$0xff]  }
  0x70   : > { %1427 = vmatpush1.bf16.msra.mxu0 %v3111_v26  ;;  %v3260_v26 = vld [vmem:[#allocation2 + $0xe0] ss:$8 sps:$4 sm:$0xff]  }
  0x71   : > { %1428 = vmatprep.subr.bf16.mxu0 %v3112_v28  ;;  %v3264_v28 = vld [vmem:[#allocation2 + $0xf4] ss:$8 sps:$4 sm:$0xff]  }
  0x72   : > { %1382 = vmatpush1.bf16.msra.mxu1 %v3230_v4  ;;  %v3237_v4 = vld [vmem:[#allocation2 + $0x3a0] ss:$8 sps:$4 sm:$0xff]  }
  0x73   : > { %1383 = vmatprep.subr.bf16.mxu1 %v3234_v5  ;;  %v3245_v5 = vld [vmem:[#allocation2 + $0x3b4] ss:$8 sps:$4 sm:$0xff]  }
  0x74   : > { %1429 = vmatpush1.bf16.msra.mxu0 %v3114_v30  ;;  %v3266_v30 = vld [vmem:[#allocation2 + $0xf0] ss:$8 sps:$4 sm:$0xff]  }
  0x75   : > { %1430 = vmatprep.subr.bf16.mxu0 %v3115_v33  ;;  %v587_v33 = vpack.c.bf16 %v571_v11, %v571_v11  ;;  %v3263_v11 = vld [vmem:[#allocation2 + $0x3e4] ss:$8 sps:$4 sm:$0xff]  }
  0x76   : > { %1384 = vmatpush1.bf16.msra.mxu1 %v3236_v8  ;;  %v3249_v8 = vld [vmem:[#allocation2 + $0x3c0] ss:$8 sps:$4 sm:$0xff]  }
  0x77   : > { %1385 = vmatprep.subr.bf16.mxu1 %v3240_v9  ;;  %v3257_v9 = vld [vmem:[#allocation2 + $0x3d4] ss:$8 sps:$4 sm:$0xff]  }
  0x78   : > { %1431 = vmatpush1.bf16.msra.mxu0 %v3117_v36  ;;  %v3161_v36 = vld [vmem:[#allocation2 + $0x2c0] ss:$8 sps:$4 sm:$0xff]  }
  0x79   : > { %1432 = vmatprep.subr.bf16.mxu0 %v3118_v37  ;;  %v3166_v37 = vld [vmem:[#allocation2 + $0x2d4] ss:$8 sps:$4 sm:$0xff]  }
  0x7a   : > { %1386 = vmatpush1.bf16.msra.mxu1 %v3242_v15 }
  0x7b   : > { %1387 = vmatprep.subr.bf16.mxu1 %v3246_v16  ;;  %v3434_v16 = vmov 0  }
  0x7c   : > { %1433 = vmatpush1.bf16.msra.mxu0 %v3120_v39  ;;  %v3169_v39 = vld [vmem:[#allocation2 + $0x2e4] ss:$8 sps:$4 sm:$0xff]   ;;  %3074 = vset.pattern.permute.xlu0 %v3434_v16 }
  0x7d   : > { %1434 = vmatprep.subr.bf16.mxu0 %v3121_v42  ;;  %v3638_v42 = vld [vmem:[%s3622_s26 + $0x18] sm:$0x77]  ;;  %3075 = vset.pattern.permute.xlu1 %v3434_v16  ;;  %s4017_s26 = sshll.u32 %s3728_s29, 4 }
  0x7e   : > { %1388 = vmatpush1.bf16.msra.mxu1 %v3248_v18  ;;  %v582_v45 = vcombine.high %v3638_v42, %v3638_v42  ;;  %v593_v15 = vpack.c.bf16 %v3638_v42, %v3638_v42  ;;  %1535 = vperm.xlu0 %3074, %v1531_v17   ;;  %v1532_v18 = vld [vmem:[%s4014_s3 + $0x8] sm:$0xff]  ;;  %s3789_s19 = scalar_lea.vmem [#allocation6], %s4017_s26  ;;  %s3008_s26 = smul.u32 24, %s3614_s21 }
  0x7f   : > { %1389 = vmatprep.subr.bf16.mxu1 %v3252_v20  ;;  %v2008_v20 = vld [vmem:[%s3977_s9] sm:$0xff]  ;;  %v1798_v17 = vld [vmem:[%s3974_s6 + $0x8] sm:$0xff]  ;;  %s2488_s28 = sshll.u32 %s3789_s19, 4  ;;  %s3438_s3 = smov [#allocation5]   ;;  %s3867_s28 = int_to_ptr.vmem [resolvable:$true] %s2488_s28 }
  0x80   : > { %1435 = vmatpush1.bf16.msra.mxu0 %v3123_v44  ;;  %v3170_v44 = vld [vmem:[#allocation2 + $0x2f0] ss:$8 sps:$4 sm:$0xff]   ;;  %s3826_s17 = scalar_lea.vmem %s3983_s15, %s3008_s26 }
  0x81   : > { %1445 = vmatprep.subr.bf16.mxu0 %v3127_v48  ;;  %v3177_v48 = vld [vmem:[#allocation2 + $0x300] ss:$8 sps:$4 sm:$0xff]  }
  0x82   : > { %1390 = vmatpush1.bf16.msra.mxu1 %v3254_v22  ;;  %1540 = vperm.xlu0 %3074, %v1532_v18   ;;  %v2012_v22 = vld [vmem:[%s3977_s9 + $0x20] sm:$0xff]  ;;  %v1800_v18 = vld [vmem:[%s3974_s6 + $0x18] sm:$0xff] }
  0x83   : > { %1437 = vmatmul.mubr.bf16.vlgmr.msra.gmra.mrb[0].mxu0 %v589_v49  ;;  %1391 = vmatprep.subr.bf16.mxu1 %v3258_v24  ;;  %v594_v49 = vpack.c.bf16 %v582_v45, %v582_v45  ;;  %v2250_v24 = vld [vmem:[%s3980_s12 + $0x10] sm:$0xff] }
  0x84   : > { %1446 = vmatpush1.bf16.msra.mxu0 %v3125_v51  ;;  %1477 = vmatprep.mubr.bf16.mxu0 %v592_v52  ;;  %v3183_v51 = vld [vmem:[#allocation2 + $0x310] ss:$8 sps:$4 sm:$0xff]   ;;  %v3191_v52 = vld [vmem:[#allocation2 + $0x324] ss:$8 sps:$4 sm:$0xff]  }
  0x85   : > { %1447 = vmatprep.subr.bf16.mxu0 %v3130_v53  ;;  %v3189_v53 = vld [vmem:[#allocation2 + $0x320] ss:$8 sps:$4 sm:$0xff]  }
  0x86   : > { %1392 = vmatpush1.bf16.msra.mxu1 %v3260_v26 }
  0x87   : > { %1393 = vmatprep.subr.bf16.mxu1 %v3264_v28 }
  0x88   : > { %1448 = vmatpush1.bf16.msra.mxu0 %v3128_v55  ;;  %v3195_v55 = vld [vmem:[#allocation2 + $0x330] ss:$8 sps:$4 sm:$0xff]  }
  0x89   : > { %1449 = vmatprep.subr.bf16.mxu0 %v3133_v58  ;;  %v3207_v58 = vld [vmem:[#allocation2 + $0x350] ss:$8 sps:$4 sm:$0xff]  }
  0x8a   : > { %1394 = vmatpush1.bf16.msra.mxu1 %v3266_v30  ;;  %v2254_v30 = vld [vmem:[%s3980_s12 + $0x30] sm:$0xff] }
  0x8c   : > { %1450 = vmatpush1.bf16.msra.mxu0 %v3131_v59  ;;  %v3215_v59 = vld [vmem:[#allocation2 + $0x364] ss:$8 sps:$4 sm:$0xff]  }
  0x8d   : > { %1451 = vmatprep.subr.bf16.mxu0 %v3136_v62  ;;  %1396 = vmatmul.mubr.bf16.vlgmr.msra.gmra.mrb[0].mxu1 %v587_v33  ;;  %v3219_v62 = vld [vmem:[#allocation2 + $0x370] ss:$8 sps:$4 sm:$0xff]  }
  0x8e   : > { %1594 = vmatprep.mubr.bf16.mxu1 %v3434_v16  ;;  %v1797_v16 = vld [vmem:[%s3974_s6] sm:$0xff] }
  0x8f   : > { %1803 = vperm.xlu1 %3075, %v1797_v16  }
  0x90   : > { %1452 = vmatpush1.bf16.msra.mxu0 %v3134_v63  ;;  %v3227_v63 = vld [vmem:[#allocation2 + $0x384] ss:$8 sps:$4 sm:$0xff]  }
  0x91   : > { %1453 = vmatprep.subr.bf16.mxu0 %v3139_v2  ;;  %v3231_v2 = vld [vmem:[#allocation2 + $0x390] ss:$8 sps:$4 sm:$0xff]  }
  0x93   : > { %1808 = vperm.xlu1 %3075, %v1798_v17  }
  0x94   : > { %1454 = vmatpush1.bf16.msra.mxu0 %v3137_v3  ;;  %v3239_v3 = vld [vmem:[#allocation2 + $0x3a4] ss:$8 sps:$4 sm:$0xff]  }
  0x95   : > { %1455 = vmatprep.subr.bf16.mxu0 %v3142_v6  ;;  %v3243_v6 = vld [vmem:[#allocation2 + $0x3b0] ss:$8 sps:$4 sm:$0xff]  }
  0x97   : > { %1818 = vperm.xlu1 %3075, %v1800_v18  }
  0x98   : > { %1456 = vmatpush1.bf16.msra.mxu0 %v3140_v7  ;;  %v3251_v7 = vld [vmem:[#allocation2 + $0x3c4] ss:$8 sps:$4 sm:$0xff]  }
  0x99   : > { %1457 = vmatprep.subr.bf16.mxu0 %v3145_v10  ;;  %v3255_v10 = vld [vmem:[#allocation2 + $0x3d0] ss:$8 sps:$4 sm:$0xff]  }
  0x9c   : > { %1458 = vmatpush1.bf16.msra.mxu0 %v3143_v12  ;;  %v3261_v12 = vld [vmem:[#allocation2 + $0x3e0] ss:$8 sps:$4 sm:$0xff]  }
  0x9d   : > { %1459 = vmatprep.subr.bf16.mxu0 %v3148_v14  ;;  %v3268_v14 = vld [vmem:[#allocation2 + $0x3f0] ss:$8 sps:$4 sm:$0xff]  }
  0xa0   : > { %1460 = vmatpush1.bf16.msra.mxu0 %v3146_v19  ;;  %v1799_v19 = vld [vmem:[%s3974_s6 + $0x10] sm:$0xff] }
  0xa1   : > { %1461 = vmatprep.subr.bf16.mxu0 %v3151_v21  ;;  %1813 = vperm.xlu0 %3074, %v1799_v19   ;;  %v2010_v21 = vld [vmem:[%s3977_s9 + $0x10] sm:$0xff]  ;;  %v2009_v19 = vld [vmem:[%s3977_s9 + $0x8] sm:$0xff] }
  0xa2   : > { %2021 = vperm.xlu1 %3075, %v2009_v19  }
  0xa4   : > { %1462 = vmatpush1.bf16.msra.mxu0 %v3149_v23  ;;  %v2248_v23 = vld [vmem:[%s3980_s12] sm:$0xff] }
  0xa5   : > { %1463 = vmatprep.subr.bf16.mxu0 %v3154_v25  ;;  %2016 = vperm.xlu0 %3074, %v2008_v20   ;;  %v2252_v25 = vld [vmem:[%s3980_s12 + $0x20] sm:$0xff]  ;;  %v2011_v20 = vld [vmem:[%s3977_s9 + $0x18] sm:$0xff] }
  0xa6   : > { %2031 = vperm.xlu1 %3075, %v2011_v20  }
  0xa8   : > { %1464 = vmatpush1.bf16.msra.mxu0 %v3152_v27 }
  0xa9   : > { %1465 = vmatprep.subr.bf16.mxu0 %v3157_v29  ;;  %2026 = vperm.xlu0 %3074, %v2010_v21   ;;  %v2013_v21 = vld [vmem:[%s3977_s9 + $0x28] sm:$0xff] }
  0xaa   : > { %2041 = vperm.xlu1 %3075, %v2013_v21  }
  0xac   : > { %1466 = vmatpush1.bf16.msra.mxu0 %v3155_v31 }
  0xad   : > { %1467 = vmatprep.subr.bf16.mxu0 %v3160_v32  ;;  %2036 = vperm.xlu0 %3074, %v2012_v22   ;;  %v3435_v32 = vmov 65535   ;;  %v2249_v22 = vld [vmem:[%s3980_s12 + $0x8] sm:$0xff] }
  0xae   : > { %v1554_v33 = vsel %vm1552_vm0, 4294967295, %v3435_v32  ;;  %2263 = vperm.xlu1 %3075, %v2249_v22  }
  0xb0   : > { %1468 = vmatpush1.bf16.msra.mxu0 %v3158_v34 }
  0xb1   : > { %1469 = vmatprep.subr.bf16.mxu0 %v3163_v35  ;;  %2258 = vperm.xlu0 %3074, %v2248_v23   ;;  %v2251_v23 = vld [vmem:[%s3980_s12 + $0x18] sm:$0xff] }
  0xb2   : > { %2273 = vperm.xlu1 %3075, %v2251_v23  }
  0xb4   : > { %1470 = vmatpush1.bf16.msra.mxu0 %v3161_v36 }
  0xb5   : > { %1471 = vmatprep.subr.bf16.mxu0 %v3166_v37  ;;  %2268 = vperm.xlu0 %3074, %v2250_v24   ;;  %v2253_v24 = vld [vmem:[%s3980_s12 + $0x28] sm:$0xff] }
  0xb6   : > { %2283 = vperm.xlu1 %3075, %v2253_v24  }
  0xb8   : > { %1472 = vmatpush1.bf16.msra.mxu0 %v3164_v38 }
  0xb9   : > { %1473 = vmatprep.subr.bf16.mxu0 %v3169_v39  ;;  %2278 = vperm.xlu0 %3074, %v2252_v25   ;;  %v1555_v39 = vsel %vm1553_vm1, %v1554_v33, 0  ;;  %v2255_v25 = vld [vmem:[%s3980_s12 + $0x38] sm:$0xff]  ;;  %v3291_v33 = vld [vmem:[%s3975_s7] sm:$0xff]  }
  0xba   : > { %2293 = vperm.xlu1 %3075, %v2255_v25  }
  0xbc   : > { %1474 = vmatpush1.bf16.msra.mxu0 %v3167_v40 }
  0xbd   : > { %1475 = vmatprep.subr.bf16.mxu0 %v3172_v41  ;;  %2288 = vperm.xlu0 %3074, %v2254_v30  }
  0xc0   : > { %1476 = vmatpush1.bf16.msra.mxu0 %v3170_v44  ;;  %v3273_v44 = vld [vmem:[%s4015_s4 + $0x40] sm:$0xff]  }
  0xc1   : > { %1486 = vmatprep.subr.bf16.mxu0 %v3179_v46  ;;  %v3272_v46 = vld [vmem:[%s4016_s2] sm:$0xff]   ;;  %s3873_s2 = scalar_lea.hbm %s3981_s13, %s2887_s20 }
  0xc3   : > { %1478 = vmatmul.mubr.bf16.vlgmr.msra.gmra.mrb[0].mxu0 %v591_v47  ;;  %v3274_v47 = vld [vmem:[%s4015_s4] sm:$0xff]  }
  0xc4   : > { %1487 = vmatpush1.bf16.msra.mxu0 %v3177_v48  ;;  %1518 = vmatprep.mubr.bf16.mxu0 %v594_v49  ;;  %v3275_v48 = vld [vmem:[%s4015_s4 + $0x48] sm:$0xff]  }
  0xc5   : > { %1488 = vmatprep.subr.bf16.mxu0 %v3185_v50  ;;  %v3276_v49 = vld [vmem:[%s4015_s4 + $0x8] sm:$0xff]   ;;  %v3277_v50 = vld [vmem:[%s4015_s4 + $0x50] sm:$0xff]  }
  0xc8   : > { %1489 = vmatpush1.bf16.msra.mxu0 %v3183_v51  ;;  %v3278_v51 = vld [vmem:[%s4015_s4 + $0x10] sm:$0xff]  }
  0xc9   : > { %1490 = vmatprep.subr.bf16.mxu0 %v3191_v52  ;;  %v3279_v52 = vld [vmem:[%s4015_s4 + $0x58] sm:$0xff]  }
  0xcc   : > { %1491 = vmatpush1.bf16.msra.mxu0 %v3189_v53  ;;  %v3280_v53 = vld [vmem:[%s4015_s4 + $0x18] sm:$0xff]  }
  0xcd   : > { %1492 = vmatprep.subr.bf16.mxu0 %v3197_v54  ;;  %v3281_v54 = vld [vmem:[%s4015_s4 + $0x60] sm:$0xff]  }
  0xd0   : > { %1493 = vmatpush1.bf16.msra.mxu0 %v3195_v55  ;;  %v3282_v55 = vld [vmem:[%s4015_s4 + $0x20] sm:$0xff]  }
  0xd1   : > { %1494 = vmatprep.subr.bf16.mxu0 %v3203_v56  ;;  %v3283_v56 = vld [vmem:[%s4015_s4 + $0x68] sm:$0xff]  }
  0xd4   : > { %1495 = vmatpush1.bf16.msra.mxu0 %v3201_v43  ;;  %v3284_v43 = vld [vmem:[%s4015_s4 + $0x28] sm:$0xff]  }
  0xd5   : > { %1496 = vmatprep.subr.bf16.mxu0 %v3209_v57  ;;  %v3285_v57 = vld [vmem:[%s4015_s4 + $0x70] sm:$0xff]  }
  0xd8   : > { %1497 = vmatpush1.bf16.msra.mxu0 %v3207_v58  ;;  %v3286_v58 = vld [vmem:[%s4015_s4 + $0x30] sm:$0xff]  }
  0xd9   : > { %1498 = vmatprep.subr.bf16.mxu0 %v3215_v59  ;;  %v3287_v59 = vld [vmem:[%s4015_s4 + $0x78] sm:$0xff]  }
  0xdc   : > { %1499 = vmatpush1.bf16.msra.mxu0 %v3213_v60  ;;  %v3288_v60 = vld [vmem:[%s4015_s4 + $0x38] sm:$0xff]   ;;  %s3335_s4 = sshll.u32 %s3438_s3, 4  ;;  %s3336_s4 = int_to_ptr.vmem [resolvable:$false] %s3335_s4 }
  0xdd   : > { %1500 = vmatprep.subr.bf16.mxu0 %v3221_v61  ;;  %s3337_s25 = scalar_lea.vmem %s3336_s4, 512 }
  0xe0   : > { %1501 = vmatpush1.bf16.msra.mxu0 %v3219_v62 }
  0xe1   : > { %1502 = vmatprep.subr.bf16.mxu0 %v3227_v63 }
  0xe4   : > { %1503 = vmatpush1.bf16.msra.mxu0 %v3225_v0 }
  0xe5   : > { %1504 = vmatprep.subr.bf16.mxu0 %v3233_v1 }
  0xe8   : > { %1505 = vmatpush1.bf16.msra.mxu0 %v3231_v2 }
  0xe9   : > { %1506 = vmatprep.subr.bf16.mxu0 %v3239_v3 }
  0xec   : > { %1507 = vmatpush1.bf16.msra.mxu0 %v3237_v4 }
  0xed   : > { %1508 = vmatprep.subr.bf16.mxu0 %v3245_v5 }
  0xf0   : > { %1509 = vmatpush1.bf16.msra.mxu0 %v3243_v6 }
  0xf1   : > { %1510 = vmatprep.subr.bf16.mxu0 %v3251_v7 }
  0xf4   : > { %1511 = vmatpush1.bf16.msra.mxu0 %v3249_v8 }
  0xf5   : > { %1512 = vmatprep.subr.bf16.mxu0 %v3257_v9 }
  0xf8   : > { %1513 = vmatpush1.bf16.msra.mxu0 %v3255_v10 }
  0xf9   : > { %1514 = vmatprep.subr.bf16.mxu0 %v3263_v11 }
  0xfc   : > { %1515 = vmatpush1.bf16.msra.mxu0 %v3261_v12 }
  0xfd   : > { %1516 = vmatprep.subr.bf16.mxu0 %v3270_v13  ;;  %v1536_v61 = vpop.permute.xlu0 %1535 }
 0x100   : > { %1517 = vmatpush1.bf16.msra.mxu0 %v3268_v14 }
 0x101   : > { %v1541_v1 = vpop.permute.xlu0 %1540 }
 0x103   : > { %1519 = vmatmul.mubr.bf16.vlgmr.msra.gmra.mrb[0].mxu0 %v593_v15  ;;  %v3289_v15 = vld [vmem:[%s3973_s5] sm:$0xff]  }
 0x160   : > { %v1397_v26 = vpop.f32.mrb[0].mxu1 }
 0x161   : > { %v1399_v27 = vpop.f32.mrb[1].mxu1 }
 0x162   : > { %v1401_v28 = vpop.f32.mrb[2].mxu1 }
 0x163   : > { %v1402_v29 = vpop.f32.mrb[3].mxu1 }
 0x1d6   : > { %v1520_v31 = vpop.f32.mrb[0].mxu0 }
 0x1d7   : > { %v2998_v34 = vadd.f32 %v1520_v31, %v1397_v26  ;;  %v1522_v35 = vpop.f32.mrb[1].mxu0 }
 0x1d8   : > { %v2999_v36 = vadd.f32 %v1522_v35, %v1399_v27  ;;  %v1524_v37 = vpop.f32.mrb[2].mxu0  ;;  %v3292_v35 = vld [vmem:[%s3975_s7 + $0x8] sm:$0xff]  }
 0x1d9   : > { %v1527_v38 = vpack.c.bf16 %v2998_v34, %v2998_v34  ;;  %v1525_v40 = vpop.f32.mrb[3].mxu0  ;;  %v3290_v34 = vld [vmem:[%s3973_s5 + $0x8] sm:$0xff]   ;;  %v3294_v37 = vld [vmem:[%s3975_s7 + $0x18] sm:$0xff]  }
 0x1da   : > { %v1528_v41 = vpack.c.bf16 %v2999_v36, %v2999_v36  ;;  %v3293_v36 = vld [vmem:[%s3975_s7 + $0x10] sm:$0xff]   ;;  %v1814_v40 = vpop.permute.xlu0 %1813 }
 0x1db   : > { %v1557_v45 = vand.u32 %v1555_v39, %v1527_v38  ;;  %v1804_v38 = vpop.permute.xlu1 %1803 }
 0x1dc   : > { %v1560_v42 = vand.u32 %v1555_v39, %v1528_v41 }
 0x1de   : > { %1562 = vmatprep.subr.bf16.mxu1 %v1560_v42 }
 0x1df   : > { %1563 = vmatpush1.bf16.msra.mxu1 %v1557_v45  ;;  %v1809_v39 = vpop.permute.xlu1 %1808 }
 0x1e0   : > { %2889 = vmatprep.subr.bf16.mxu1 %v3273_v44 }
 0x1e2   : > { %2792 = vmatmul.mubr.msk.bf16.vlgmr.msra.gmra.mrb[4].mxu1 %vm1548_vm2, %v3272_v46 }
 0x1e3   : > { %2890 = vmatpush3.bf16.msra.mxu1 %v3274_v47  ;;  %v1819_v45 = vpop.permute.xlu1 %1818 }
 0x1e4   : > { %2891 = vmatprep.subr.bf16.mxu1 %v3275_v48 }
 0x1e7   : > { %2892 = vmatpush3.bf16.msra.mxu1 %v3276_v49 }
 0x1e8   : > { %2893 = vmatprep.subr.bf16.mxu1 %v3277_v50 }
 0x1eb   : > { %2894 = vmatpush3.bf16.msra.mxu1 %v3278_v51 }
 0x1ec   : > { %2895 = vmatprep.subr.bf16.mxu1 %v3279_v52 }
 0x1ef   : > { %2896 = vmatpush3.bf16.msra.mxu1 %v3280_v53 }
 0x1f0   : > { %2897 = vmatprep.subr.bf16.mxu1 %v3281_v54 }
 0x1f3   : > { %2898 = vmatpush3.bf16.msra.mxu1 %v3282_v55 }
 0x1f4   : > { %2899 = vmatprep.subr.bf16.mxu1 %v3283_v56 }
 0x1f7   : > { %2900 = vmatpush3.bf16.msra.mxu1 %v3284_v43 }
 0x1f8   : > { %2901 = vmatprep.subr.bf16.mxu1 %v3285_v57 }
 0x1fb   : > { %2902 = vmatpush3.bf16.msra.mxu1 %v3286_v58 }
 0x1fc   : > { %2903 = vmatprep.subr.bf16.mxu1 %v3287_v59 }
 0x1ff   : > { %2904 = vmatpush3.bf16.msra.mxu1 %v3288_v60  ;;  %v3436_v60 = vmov 0.0  }
 0x2b5   : > { %v1596_v62 = vpop.f32.mrb[4].mxu1 }
 0x2b6   : > { %v1597_v63 = vadd.f32 %v1596_v62, %v1536_v61  ;;  %v1598_v0 = vpop.f32.mrb[5].mxu1 }
 0x2b7   : > { %v1599_v2 = vadd.f32 %v1598_v0, %v1536_v61  ;;  %v1600_v3 = vpop.f32.mrb[6].mxu1 }
 0x2b8   : > { %v1605_v4 = vmax.f32 %v1597_v63, 0.0  ;;  %v1601_v5 = vadd.f32 %v1600_v3, %v1541_v1  ;;  %v1602_v6 = vpop.f32.mrb[7].mxu1  ;;  %v3295_v3 = vld [vmem:[%s3976_s8] sm:$0xff]  }
 0x2b9   : > { %v1606_v7 = vmax.f32 %v1599_v2, 0.0  ;;  %v1603_v8 = vadd.f32 %v1602_v6, %v1541_v1  ;;  %v3297_v6 = vld [vmem:[%s3976_s8 + $0x10] sm:$0xff]  }
 0x2ba   : > { %v1607_v9 = vmax.f32 %v1601_v5, 0.0  ;;  %v3296_v5 = vld [vmem:[%s3976_s8 + $0x8] sm:$0xff]  }
 0x2bb   : > { %v2867_v10 = vpack.c.bf16 %v1606_v7, %v1605_v4  ;;  %v1608_v11 = vmax.f32 %v1603_v8, 0.0 }
 0x2bc   : > { %v1609_v12 = vpack.c.bf16 %v1607_v9, %v1605_v4  ;;  %v3298_v4 = vld [vmem:[%s3978_s10] sm:$0xff]  }
 0x2bd   : > { %1621 = vst [vmem:[%s3733_s18] sm:$0xff] %v2867_v10  ;;  %v1610_v13 = vpack.c.bf16 %v1608_v11, %v1606_v7  ;;  %v2868_v14 = vpack.c.bf16 %v1608_v11, %v1607_v9  ;;  %v2017_v7 = vpop.permute.xlu0 %2016  ;;  %v2022_v11 = vpop.permute.xlu1 %2021 }
 0x2bf   : > { %1622 = vst [vmem:[%s3733_s18 + $0x8] sm:$0xff] %v2868_v14  ;;  %1783 = vmatprep.mubr.bf16.mxu1 %v1610_v13 }
 0x2c0   : > { %1784 = vmatmul.mubr.bf16.vlgmr.msra.gmra.mrb[8].mxu1 %v1609_v12 }
 0x2c1   : > { %2938 = vmatprep.mubr.msk.bf16.mxu1 %vm1831_vm3, %v3289_v15  ;;  %v2027_v20 = vpop.permute.xlu0 %2026  ;;  %v2032_v24 = vpop.permute.xlu1 %2031 }
 0x393   : > { %v2905_v26 = vpop.f32.mrb[8].mxu1 }
 0x394   : > { %v2906_v27 = vpop.f32.mrb[9].mxu1 }
 0x395   : > { %v2907_v28 = vadd.f32 %v2906_v27, %v2905_v26  ;;  %v2908_v29 = vpop.f32.mrb[10].mxu1 }
 0x396   : > { %v2909_v30 = vpop.f32.mrb[11].mxu1 }
 0x397   : > { %v2910_v31 = vadd.f32 %v2909_v30, %v2908_v29 }
 0x399   : > { %v1792_v32 = vpack.c.bf16 %v2910_v31, %v2907_v28 }
 0x39b   : > { %2936 = vmatprep.subr.bf16.mxu1 %v1792_v32 }
 0x39c   : > { %2937 = vmatpush3.bf16.msra.mxu1 %v1792_v32 }
 0x39d   : > { %2942 = vmatprep.subr.bf16.mxu1 %v3291_v33 }
 0x39f   : > { %2939 = vmatmul.mubr.msk.bf16.vlgmr.msra.gmra.mrb[12].mxu1 %vm1831_vm3, %v3290_v34 }
 0x3a0   : > { %2943 = vmatpush3.bf16.msra.mxu1 %v3291_v33  ;;  %v2037_v33 = vpop.permute.xlu0 %2036 }
 0x3a1   : > { %2944 = vmatprep.subr.bf16.mxu1 %v3292_v35 }
 0x3a4   : > { %2945 = vmatpush3.bf16.msra.mxu1 %v3292_v35 }
 0x3a5   : > { %2946 = vmatprep.subr.bf16.mxu1 %v3293_v36 }
 0x3a8   : > { %2947 = vmatpush3.bf16.msra.mxu1 %v3293_v36 }
 0x3a9   : > { %2948 = vmatprep.subr.bf16.mxu1 %v3294_v37 }
 0x3ac   : > { %2949 = vmatpush3.bf16.msra.mxu1 %v3294_v37  ;;  %v2042_v37 = vpop.permute.xlu1 %2041 }
 0x3ad   : > { %2954 = vmatprep.subr.bf16.mxu1 %v3436_v60 }
 0x472   : > { %v2940_v41 = vpop.f32.mrb[12].mxu1 }
 0x473   : > { %v1881_v42 = vadd.f32 %v2940_v41, %v1814_v40  ;;  %v1872_v44 = vpop.f32.mrb[13].mxu1 }
 0x474   : > { %v1873_v46 = vadd.f32 %v1872_v44, %v1804_v38  ;;  %v2941_v47 = vpop.f32.mrb[14].mxu1 }
 0x475   : > { %v1889_v48 = vmax.f32 %v1881_v42, 0.0  ;;  %v1884_v49 = vadd.f32 %v2941_v47, %v1819_v45  ;;  %v1875_v50 = vpop.f32.mrb[15].mxu1  ;;  %v3299_v47 = vld [vmem:[%s3979_s11] sm:$0xff]  }
 0x476   : > { %v1887_v51 = vmax.f32 %v1873_v46, 0.0  ;;  %v1876_v52 = vadd.f32 %v1875_v50, %v1809_v39 }
 0x477   : > { %v2871_v53 = vpack.c.bf16 %v1889_v48, %v1889_v48  ;;  %v1890_v54 = vmax.f32 %v1884_v49, 0.0 }
 0x478   : > { %v2869_v55 = vpack.c.bf16 %v1887_v51, %v1887_v51  ;;  %v1888_v56 = vmax.f32 %v1876_v52, 0.0 }
 0x479   : > { %1910 = vst.msk [vmem:[%s3789_s19 + $0x8] sm:$0xf] %vm1907_vm4, %v2871_v53  ;;  %v1892_v43 = vpack.c.bf16 %v1890_v54, %v1889_v48  ;;  %v2872_v57 = vpack.c.bf16 %v1890_v54, %v1890_v54 }
 0x47a   : > { %1908 = vst.msk [vmem:[%s3789_s19] sm:$0xf] %vm1907_vm4, %v2869_v55  ;;  %v1891_v58 = vpack.c.bf16 %v1888_v56, %v1887_v51  ;;  %v2870_v59 = vpack.c.bf16 %v1888_v56, %v1888_v56 }
 0x47b   : > { %1911 = vst.msk [vmem:[%s3789_s19 + $0xc] sm:$0xf] %vm1907_vm4, %v2872_v57 }
 0x47c   : > { %1909 = vst.msk [vmem:[%s3789_s19 + $0x4] sm:$0xf] %vm1907_vm4, %v2870_v59  ;;  %2950 = vmatprep.mubr.msk.bf16.mxu1 %vm1944_vm5, %v1891_v58 }
 0x47d   : > { %2951 = vmatmul.mubr.msk.bf16.vlgmr.msra.gmra.mrb[16].mxu1 %vm1944_vm5, %v1892_v43 }
 0x47e   : > { %2958 = vmatprep.mubr.msk.bf16.mxu1 %vm3437_vm6, %v3436_v60 }
 0x550   : > { %v2952_v61 = vpop.f32.mrb[16].mxu1 }
 0x551   : > { %v1985_v62 = vpop.f32.mrb[17].mxu1 }
 0x552   : > { %v2953_v63 = vpop.f32.mrb[18].mxu1 }
 0x553   : > { %v2001_v0 = vpack.c.bf16 %v2953_v63, %v2952_v61  ;;  %v1988_v1 = vpop.f32.mrb[19].mxu1  ;;  %v3301_v63 = vld [vmem:[%s3979_s11 + $0x10] sm:$0xff]  }
 0x554   : > { %v2000_v2 = vpack.c.bf16 %v1988_v1, %v1985_v62  ;;  %v3300_v62 = vld [vmem:[%s3979_s11 + $0x8] sm:$0xff]  }
 0x556   : > { %2955 = vmatpush3.bf16.msra.mxu1 %v2000_v2 }
 0x557   : > { %2956 = vmatprep.subr.bf16.mxu1 %v3436_v60 }
 0x55a   : > { %2957 = vmatpush3.bf16.msra.mxu1 %v2001_v0  ;;  %v3302_v0 = vld [vmem:[%s3979_s11 + $0x18] sm:$0xff]  }
 0x55b   : > { %2970 = vmatprep.subr.bf16.mxu1 %v3436_v60 }
 0x55d   : > { %2959 = vmatmul.mubr.msk.bf16.vlgmr.msra.gmra.mrb[20].mxu1 %vm2059_vm7, %v3295_v3 }
 0x55e   : > { %2962 = vmatprep.mubr.msk.bf16.mxu1 %vm3437_vm6, %v3436_v60  ;;  %2971 = vmatpush3.bf16.msra.mxu1 %v3298_v4 }
 0x565   : > { %2963 = vmatmul.mubr.msk.bf16.gmra.mrb[24].mxu1 %vm2059_vm7, %v3296_v5 }
 0x566   : > { %2966 = vmatprep.mubr.msk.bf16.mxu1 %vm3437_vm6, %v3436_v60 }
 0x56d   : > { %2967 = vmatmul.mubr.msk.bf16.gmra.mrb[28].mxu1 %vm2059_vm7, %v3297_v6 }
 0x56e   : > { %2972 = vmatprep.mubr.msk.bf16.mxu1 %vm3437_vm6, %v3436_v60 }
 0x630   : > { %v2103_v8 = vpop.f32.mrb[20].mxu1 }
 0x631   : > { %v2104_v9 = vadd.f32 %v2103_v8, %v2017_v7  ;;  %v2960_v10 = vpop.f32.mrb[21].mxu1 }
 0x632   : > { %v2106_v12 = vpop.f32.mrb[22].mxu1 }
 0x633   : > { %v2126_v13 = vmax.f32 %v2104_v9, 0.0  ;;  %v2107_v14 = vadd.f32 %v2106_v12, %v2022_v11  ;;  %v2961_v15 = vpop.f32.mrb[23].mxu1 }
 0x635   : > { %v2873_v16 = vpack.c.bf16 %v2126_v13, %v2126_v13  ;;  %v2127_v17 = vmax.f32 %v2107_v14, 0.0 }
 0x637   : > { %2157 = vst.msk [vmem:[%s3826_s17] sm:$0xf] %vm2156_vm8, %v2873_v16  ;;  %v2132_v18 = vpack.c.bf16 %v2127_v17, %v2126_v13  ;;  %v2874_v19 = vpack.c.bf16 %v2127_v17, %v2127_v17 }
 0x638   : > { %v2111_v21 = vpop.f32.mrb[24].mxu1 }
 0x639   : > { %2158 = vst.msk [vmem:[%s3826_s17 + $0x4] sm:$0xf] %vm2156_vm8, %v2874_v19  ;;  %v2112_v22 = vadd.f32 %v2111_v21, %v2027_v20  ;;  %v2964_v23 = vpop.f32.mrb[25].mxu1  ;;  %2973 = vmatmul.mubr.msk.bf16.vlgmr.msra.gmra.mrb[32].mxu1 %vm1831_vm3, %v2132_v18 }
 0x63a   : > { %v2114_v25 = vpop.f32.mrb[26].mxu1  ;;  %2976 = vmatprep.mubr.msk.bf16.mxu1 %vm3437_vm6, %v3436_v60 }
 0x63b   : > { %v2128_v26 = vmax.f32 %v2112_v22, 0.0  ;;  %v2115_v27 = vadd.f32 %v2114_v25, %v2032_v24  ;;  %v2965_v28 = vpop.f32.mrb[27].mxu1 }
 0x63d   : > { %v2875_v29 = vpack.c.bf16 %v2128_v26, %v2128_v26  ;;  %v2129_v30 = vmax.f32 %v2115_v27, 0.0 }
 0x63f   : > { %2159 = vst.msk [vmem:[%s3826_s17 + $0x8] sm:$0xf] %vm2156_vm8, %v2875_v29  ;;  %v2133_v31 = vpack.c.bf16 %v2129_v30, %v2128_v26  ;;  %v2876_v32 = vpack.c.bf16 %v2129_v30, %v2129_v30 }
 0x640   : > { %v2119_v34 = vpop.f32.mrb[28].mxu1 }
 0x641   : > { %2160 = vst.msk [vmem:[%s3826_s17 + $0xc] sm:$0xf] %vm2156_vm8, %v2876_v32  ;;  %v2120_v35 = vadd.f32 %v2119_v34, %v2037_v33  ;;  %v2968_v36 = vpop.f32.mrb[29].mxu1  ;;  %2977 = vmatmul.mubr.msk.bf16.gmra.mrb[36].mxu1 %vm1831_vm3, %v2133_v31 }
 0x642   : > { %v2122_v38 = vpop.f32.mrb[30].mxu1  ;;  %2980 = vmatprep.mubr.msk.bf16.mxu1 %vm3437_vm6, %v3436_v60 }
 0x643   : > { %v2130_v39 = vmax.f32 %v2120_v35, 0.0  ;;  %v2123_v40 = vadd.f32 %v2122_v38, %v2042_v37  ;;  %v2969_v41 = vpop.f32.mrb[31].mxu1 }
 0x645   : > { %v2877_v42 = vpack.c.bf16 %v2130_v39, %v2130_v39  ;;  %v2131_v44 = vmax.f32 %v2123_v40, 0.0 }
 0x647   : > { %2161 = vst.msk [vmem:[%s3826_s17 + $0x10] sm:$0xf] %vm2156_vm8, %v2877_v42  ;;  %v2134_v45 = vpack.c.bf16 %v2131_v44, %v2130_v39  ;;  %v2878_v46 = vpack.c.bf16 %v2131_v44, %v2131_v44 }
 0x649   : > { %2162 = vst.msk [vmem:[%s3826_s17 + $0x14] sm:$0xf] %vm2156_vm8, %v2878_v46  ;;  %2981 = vmatmul.mubr.msk.bf16.gmra.mrb[40].mxu1 %vm1831_vm3, %v2134_v45  ;;  %s2472_s17 = sshll.u32 %s3733_s18, 4  ;;  %s2444_s18 = scalar_lea.sflag [#allocation4], %s3728_s29  ;;  %s3865_s17 = int_to_ptr.vmem [resolvable:$true] %s2472_s17 }
 0x64a   : > { %2990 = vmatprep.mubr.msk.bf16.mxu1 %vm2316_vm9, %v3299_v47  ;;  %s3331_s19 = scalar_lea.vmem %s3865_s17, 256  ;;  %p3338_p2 = scmp.lt.s32.totalorder %s3865_s17, %s3336_s4 }
 0x64b   : > { %p3332_p6 = scmp.ne.s32.totalorder %s3865_s17, %s3331_s19  ;;  %p3339_p3 = scmp.lt.s32.totalorder %s3337_s25, %s3331_s19 }
 0x64d   : > { %p3333_p10 = pnand %p3332_p6, %p4018_p9  ;;  %p3340_p4 = por %p3339_p3, %p3338_p2 }
 0x64f   : > { %p3334_p12 = pneg %p3333_p10 }
 0x651   : > { %p3341_p7 = pnand %p3340_p4, %p3334_p12 }
 0x70c   : > { %v2214_v48 = vpop.f32.mrb[32].mxu1 }
 0x70d   : > { %v2974_v49 = vpop.f32.mrb[33].mxu1 }
 0x70e   : > { %v2217_v50 = vpop.f32.mrb[34].mxu1 }
 0x70f   : > { %v2237_v51 = vpack.c.bf16 %v2217_v50, %v2214_v48  ;;  %v2975_v52 = vpop.f32.mrb[35].mxu1 }
 0x711   : > { %2984 = vmatprep.subr.bf16.mxu1 %v2237_v51 }
 0x712   : > { %2985 = vmatpush3.bf16.msra.mxu1 %v2237_v51 }
 0x714   : > { %v2222_v53 = vpop.f32.mrb[36].mxu1 }
 0x715   : > { %v2978_v54 = vpop.f32.mrb[37].mxu1 }
 0x716   : > { %v2225_v55 = vpop.f32.mrb[38].mxu1 }
 0x717   : > { %v2238_v56 = vpack.c.bf16 %v2225_v55, %v2222_v53  ;;  %v2979_v43 = vpop.f32.mrb[39].mxu1 }
 0x719   : > { %2986 = vmatprep.subr.bf16.mxu1 %v2238_v56 }
 0x71a   : > { %2987 = vmatpush3.bf16.msra.mxu1 %v2238_v56 }
 0x71c   : > { %v2230_v57 = vpop.f32.mrb[40].mxu1 }
 0x71d   : > { %v2982_v58 = vpop.f32.mrb[41].mxu1 }
 0x71e   : > { %v2233_v59 = vpop.f32.mrb[42].mxu1 }
 0x71f   : > { %v2239_v60 = vpack.c.bf16 %v2233_v59, %v2230_v57  ;;  %v2983_v61 = vpop.f32.mrb[43].mxu1 }
 0x721   : > { %2988 = vmatprep.subr.bf16.mxu1 %v2239_v60 }
 0x722   : > { %2989 = vmatpush3.bf16.msra.mxu1 %v2239_v60 }
 0x725   : > { %2991 = vmatmul.mubr.msk.bf16.vlgmr.msra.gmra.mrb[44].mxu1 %vm2316_vm9, %v3300_v62 }
 0x726   : > { %2994 = vmatprep.mubr.msk.bf16.mxu1 %vm2316_vm9, %v3301_v63 }
 0x72d   : > { %2995 = vmatmul.mubr.msk.bf16.gmra.mrb[48].mxu1 %vm2316_vm9, %v3302_v0 }
 0x72e   : > { %3344 = shalt.err (!%p3341_p7)
}
 0x72f   : > { %s3345_s20 = scalar_lea.hbm %s3873_s2, 256  ;;  %s3349_s3 = scalar_lea.hbm %s3981_s13, 512 }
 0x730   : > { %p3346_p8 = scmp.ne.s32.totalorder %s3873_s2, %s3345_s20  ;;  %p3350_p1 = scmp.lt.u32.totalorder %s3873_s2, %s3981_s13 }
 0x731   : > { %p3351_p0 = scmp.lt.u32.totalorder %s3349_s3, %s3345_s20  ;;  %p3353_p6 = scmp.lt.u32.totalorder %s3345_s20, %s3873_s2 }
 0x732   : > { %p3347_p11 = pnand %p3346_p8, %p4018_p9 }
 0x733   : > { %p3352_p5 = por %p3351_p0, %p3350_p1 }
 0x734   : > { %p3348_p13 = pneg %p3347_p11 }
 0x735   : > { %p3354_p10 = por %p3353_p6, %p3352_p5 }
 0x737   : > { %p3355_p12 = pnand %p3354_p10, %p3348_p13 }
 0x739   : > { %3358 = shalt.err (!%p3355_p12)
}
 0x73a   : > { %s3439_s23 = smov 128   ;;  %s3440_s19 = smov 8  }
 0x73b   : > { %3013 = dma.vmem_to_hbm [thread:$0]  (%p4018_p9), %s3865_s17, 256, %s3873_s2, %s2444_s18, %s3439_s23, %s3439_s23, %s3440_s19  }
 0x73c   : > { %s2449_s25 = scalar_lea.sflag [#allocation7], %s3728_s29  ;;  %s3359_s30 = scalar_lea.vmem %s3867_s28, 256 }
 0x73d   : > { %p3360_p2 = scmp.ne.s32.totalorder %s3867_s28, %s3359_s30  ;;  %s3441_s20 = smov [#allocation6]  }
 0x73e   : > { %s3363_s1 = sshll.u32 %s3441_s20, 4  ;;  %s3364_s1 = int_to_ptr.vmem [resolvable:$false] %s3363_s1 }
 0x73f   : > { %p3361_p3 = pnand %p3360_p2, %p4018_p9  ;;  %s3365_s3 = scalar_lea.vmem %s3364_s1, 512 }
 0x740   : > { %p3366_p7 = scmp.lt.s32.totalorder %s3867_s28, %s3364_s1  ;;  %p3367_p8 = scmp.lt.s32.totalorder %s3365_s3, %s3359_s30 }
 0x741   : > { %p3362_p4 = pneg %p3361_p3 }
 0x742   : > { %p3368_p11 = por %p3367_p8, %p3366_p7 }
 0x744   : > { %p3369_p13 = pnand %p3368_p11, %p3362_p4 }
 0x746   : > { %3372 = shalt.err (!%p3369_p13)
}
 0x747   : > { %s3373_s17 = scalar_lea.hbm %s3878_s27, 256  ;;  %s3377_s26 = scalar_lea.hbm %s3982_s14, 512 }
 0x748   : > { %p3374_p1 = scmp.ne.s32.totalorder %s3878_s27, %s3373_s17  ;;  %p3378_p6 = scmp.lt.u32.totalorder %s3878_s27, %s3982_s14 }
 0x749   : > { %p3379_p10 = scmp.lt.u32.totalorder %s3377_s26, %s3373_s17  ;;  %p3381_p2 = scmp.lt.u32.totalorder %s3373_s17, %s3878_s27 }
 0x74a   : > { %p3375_p0 = pnand %p3374_p1, %p4018_p9 }
 0x74b   : > { %p3380_p12 = por %p3379_p10, %p3378_p6 }
 0x74c   : > { %p3376_p5 = pneg %p3375_p0 }
 0x74d   : > { %p3382_p3 = por %p3381_p2, %p3380_p12 }
 0x74f   : > { %p3383_p4 = pnand %p3382_p3, %p3376_p5 }
 0x751   : > { %3386 = shalt.err (!%p3383_p4)
}
 0x752   : > { %s3442_s19 = smov 64   ;;  %s3443_s30 = smov 4   ;;  %v2259_v1 = vpop.permute.xlu0 %2258  ;;  %v2264_v2 = vpop.permute.xlu1 %2263  ;;  %vm2434_vm10 = vcmask 27648  }
 0x753   : > { %3014 = dma.vmem_to_hbm [thread:$0]  (%p4018_p9), %s3867_s28, 256, %s3878_s27, %s2449_s25, %s3442_s19, %s3442_s19, %s3443_s30  }
 0x754   : > { %s4019_s20 = sshll.u32 %s3614_s21, 5 }
 0x755   : > { %s3933_s0 = scalar_lea.vmem %s3984_s16, %s4019_s20 }
 0x756   : > { %v2269_v3 = vpop.permute.xlu0 %2268  ;;  %v2274_v4 = vpop.permute.xlu1 %2273 }
 0x75a   : > { %v2279_v8 = vpop.permute.xlu0 %2278  ;;  %v2284_v14 = vpop.permute.xlu1 %2283 }
 0x75e   : > { %v2289_v22 = vpop.permute.xlu0 %2288  ;;  %v2294_v27 = vpop.permute.xlu1 %2293 }
 0x7f8   : > { %v2992_v5 = vpop.f32.mrb[44].mxu1 }
 0x7f9   : > { %v2372_v6 = vadd.f32 %v2992_v5, %v2269_v3  ;;  %v2363_v7 = vpop.f32.mrb[45].mxu1 }
 0x7fa   : > { %v2364_v9 = vadd.f32 %v2363_v7, %v2259_v1  ;;  %v2993_v10 = vpop.f32.mrb[46].mxu1 }
 0x7fb   : > { %v2396_v11 = vmax.f32 %v2372_v6, 0.0  ;;  %v2375_v12 = vadd.f32 %v2993_v10, %v2274_v4  ;;  %v2366_v13 = vpop.f32.mrb[47].mxu1 }
 0x7fc   : > { %v2394_v15 = vmax.f32 %v2364_v9, 0.0  ;;  %v2367_v16 = vadd.f32 %v2366_v13, %v2264_v2 }
 0x7fd   : > { %v2881_v17 = vpack.c.bf16 %v2396_v11, %v2396_v11  ;;  %v2397_v18 = vmax.f32 %v2375_v12, 0.0 }
 0x7fe   : > { %v2879_v19 = vpack.c.bf16 %v2394_v15, %v2394_v15  ;;  %v2395_v20 = vmax.f32 %v2367_v16, 0.0 }
 0x7ff   : > { %2437 = vst.msk [vmem:[%s3933_s0 + $0x8] sm:$0xf] %vm2434_vm10, %v2881_v17  ;;  %v2882_v21 = vpack.c.bf16 %v2397_v18, %v2397_v18 }
 0x800   : > { %2435 = vst.msk [vmem:[%s3933_s0] sm:$0xf] %vm2434_vm10, %v2879_v19  ;;  %v2880_v23 = vpack.c.bf16 %v2395_v20, %v2395_v20  ;;  %v2996_v24 = vpop.f32.mrb[48].mxu1 }
 0x801   : > { %2438 = vst.msk [vmem:[%s3933_s0 + $0xc] sm:$0xf] %vm2434_vm10, %v2882_v21  ;;  %v2388_v25 = vadd.f32 %v2996_v24, %v2289_v22  ;;  %v2379_v26 = vpop.f32.mrb[49].mxu1 }
 0x802   : > { %2436 = vst.msk [vmem:[%s3933_s0 + $0x4] sm:$0xf] %vm2434_vm10, %v2880_v23  ;;  %v2380_v28 = vadd.f32 %v2379_v26, %v2279_v8  ;;  %v2997_v29 = vpop.f32.mrb[50].mxu1 }
 0x803   : > { %v2400_v30 = vmax.f32 %v2388_v25, 0.0  ;;  %v2391_v31 = vadd.f32 %v2997_v29, %v2294_v27  ;;  %v2382_v32 = vpop.f32.mrb[51].mxu1 }
 0x804   : > { %v2398_v33 = vmax.f32 %v2380_v28, 0.0  ;;  %v2383_v34 = vadd.f32 %v2382_v32, %v2284_v14 }
 0x805   : > { %v2885_v35 = vpack.c.bf16 %v2400_v30, %v2400_v30  ;;  %v2401_v36 = vmax.f32 %v2391_v31, 0.0 }
 0x806   : > { %v2883_v37 = vpack.c.bf16 %v2398_v33, %v2398_v33  ;;  %v2399_v38 = vmax.f32 %v2383_v34, 0.0 }
 0x807   : > { %2441 = vst.msk [vmem:[%s3933_s0 + $0x18] sm:$0xf] %vm2434_vm10, %v2885_v35  ;;  %v2886_v39 = vpack.c.bf16 %v2401_v36, %v2401_v36 }
 0x808   : > { %2439 = vst.msk [vmem:[%s3933_s0 + $0x10] sm:$0xf] %vm2434_vm10, %v2883_v37  ;;  %v2884_v40 = vpack.c.bf16 %v2399_v38, %v2399_v38 }
 0x809   : > { %2442 = vst.msk [vmem:[%s3933_s0 + $0x1c] sm:$0xf] %vm2434_vm10, %v2886_v39 }
 0x80a   : > { %2440 = vst.msk [vmem:[%s3933_s0 + $0x14] sm:$0xf] %vm2434_vm10, %v2884_v40 }
 0x80b PF: > { %s4020_s21 = sld [smem:[#allocation11_spill]]  ;;  %s4021_s29 = sld [smem:[#allocation15_spill]] }
 0x80c   : > { %p3030_p9 = scmp.ge.s32.totalorder %s3429_s24, 2 }
 0x811   : > { %s2509_s28 = sand.u32 1, %s4020_s21   ;;  %p4022_p7 = scmp.ne.s32.totalorder %s4021_s29, 0 }
 0x812   : > { %s2510_s27 = scalar_lea.sflag [#allocation4], %s2509_s28 }
 0x813   : > { %p3022_p8 = pnand %p3030_p9, %p4022_p7 }
 0x815   : > { %3408 = dma.done.wait (!%p3022_p8), %s2510_s27, 256  }
 0x816   : > { %3410 = vsyncadd (!%p3022_p8), %s2510_s27, 4294967040  ;;  %s2519_s25 = scalar_lea.sflag [#allocation7], %s2509_s28 }
 0x817   : > { %3412 = dma.done.wait (!%p3022_p8), %s2519_s25, 256  }
 0x818   : > { %3414 = vsyncadd (!%p3022_p8), %s2519_s25, 4294967040  ;;  %s4023_s24 = sld [smem:[#allocation13_spill]]  ;;  %s4024_s17 = sld [smem:[#allocation12_spill]] }
 0x819   : > { %s4025_s23 = sld [smem:[#allocation14_spill]]  ;;  %s4026_s21 = smov %s3421_s22 }
 0x81e   : > { %p31_p11 = scmp.ge.s32.totalorder %s4023_s24, 4   ;;  %s4027_s22 = smov %s4024_s17 }
 0x820   :  { %33 = sbr.rel (!%p31_p11) target bundleno = 12 (0xc), region = 153 }
 0x827   :  { %2540 = vsyncpa [#allocation3], 1 }
 0x828   :  { %2542 = vsyncpa [#allocation3 + $0x1], 1 }
 0x829   :  { %2543 = vsyncpa [#allocation4], 1 }
 0x82a   :  { %2545 = vsyncpa [#allocation4 + $0x1], 1 }
 0x82b   :  { %2546 = vsyncpa [#allocation7], 1 }
 0x82c   :  { %2548 = vsyncpa [#allocation7 + $0x1], 1 }

</bundles_post_ra>
